<compile_context>
chip_gen: v6e
topology: v6e:2x2x1
jax: 0.10.0
libtpu: 0.0.40
codegen_flags: <defaults>
</compile_context>

<pallas_src>
import math
import jax
import jax.numpy as jnp
from jax.experimental import pallas as pl
from jax.experimental.pallas import tpu as pltpu

# ---- small ViT config (vit_base_patch16_224 scaled down for the demo) ----
IMG = 16
PATCH = 8
CH = 3
EMBED = 32
DEPTH = 2
HEADS = 4
HEAD_DIM = EMBED // HEADS
MLP = 4 * EMBED
NUM_PATCHES = (IMG // PATCH) ** 2          # 4
NTOK = NUM_PATCHES + 1                     # 5 (cls + patches)
NTOK_PAD = 8                               # pad each batch block to a full sublane group
PATCH_DIM = CH * PATCH * PATCH             # 192
EPS = 1e-6
SCALE = 1.0 / math.sqrt(HEAD_DIM)
NEG_INF = -1e30


# ----------------------------- in-kernel helpers -----------------------------

def _layernorm(v, g, b):
    mu = jnp.mean(v, axis=-1, keepdims=True)
    var = jnp.mean((v - mu) * (v - mu), axis=-1, keepdims=True)
    return (v - mu) * jax.lax.rsqrt(var + EPS) * g + b


def _gelu_exact(x):
    # exact (erf-based) GELU, matching torch.nn.GELU default; kept in f32.
    return 0.5 * x * (1.0 + jax.lax.erf(x * (1.0 / math.sqrt(2.0))))


# ----------------------------- fused forward kernel -----------------------------

def fused_vit_kernel(patches_ref, cls_ref, pos_ref, patch_w_ref, patch_b_ref,
                     lns_ref, qkvw_ref, qkvb_ref, projw_ref, projb_ref,
                     fc1w_ref, fc1b_ref, fc2w_ref, fc2b_ref,
                     lnf_ref, headw_ref, headb_ref,
                     o_ref, tok_ref):
    l = pl.program_id(0)                 # layer index = grid step
    B = o_ref.shape[0]

    # ---- grid step 0: patch embed + padded token assembly (one bulk store) ----
    @pl.when(l == 0)
    def _():
        pe = jnp.dot(patches_ref[...], patch_w_ref[...],
                     preferred_element_type=jnp.float32) + patch_b_ref[...]   # (B*NP, D)
        cls_tok = cls_ref[...] + pos_ref[0:1, :]                              # (1, D)
        pos_rest = pos_ref[1:, :]                                             # (NP, D)
        pad = jnp.zeros((NTOK_PAD - NTOK, EMBED), jnp.float32)
        rows = []
        for b in range(B):                        # static, tiny; runs only once
            rows.append(cls_tok)
            rows.append(pe[b * NUM_PATCHES:(b + 1) * NUM_PATCHES, :] + pos_rest)
            rows.append(pad)                      # zero pads -> finite K/V, masked keys
        tok_ref[...] = jnp.concatenate(rows, axis=0)   # single (B*NTOK_PAD, D) store

    # pad-key mask generated in-kernel (no (BN,BN) HBM mask input)
    key_id = jax.lax.broadcasted_iota(jnp.int32, (NTOK_PAD, NTOK_PAD), 1)
    pad_mask = jnp.where(key_id < NTOK, jnp.float32(0.0), jnp.float32(NEG_INF))

    # ---- one transformer block per grid step ----
    x = tok_ref[...]                              # (B*NTOK_PAD, D) f32 residual stream
    ln = lns_ref[0]                               # (4, D): ln1_g, ln1_b, ln2_g, ln2_b

    h = _layernorm(x, ln[0:1, :], ln[1:2, :])
    h_b = h.astype(jnp.bfloat16)

    # per-head Q/K/V via statically sliced weight refs (no activation lane slicing)
    q_h, k_h, v_h = [], [], []
    for hi in range(HEADS):
        lo = hi * HEAD_DIM
        wq = qkvw_ref[0, :, lo:lo + HEAD_DIM]
        wk = qkvw_ref[0, :, EMBED + lo:EMBED + lo + HEAD_DIM]
        wv = qkvw_ref[0, :, 2 * EMBED + lo:2 * EMBED + lo + HEAD_DIM]
        bq = qkvb_ref[0, :, lo:lo + HEAD_DIM]
        bk = qkvb_ref[0, :, EMBED + lo:EMBED + lo + HEAD_DIM]
        bv = qkvb_ref[0, :, 2 * EMBED + lo:2 * EMBED + lo + HEAD_DIM]
        q_h.append((jnp.dot(h_b, wq, preferred_element_type=jnp.float32) + bq
                    ).astype(jnp.bfloat16))
        k_h.append((jnp.dot(h_b, wk, preferred_element_type=jnp.float32) + bk
                    ).astype(jnp.bfloat16))
        v_h.append((jnp.dot(h_b, wv, preferred_element_type=jnp.float32) + bv
                    ).astype(jnp.bfloat16))

    # per-batch attention: scores are (NTOK_PAD, NTOK_PAD), softmax math in f32
    batch_out = []
    for b in range(B):
        r0 = b * NTOK_PAD                         # aligned 8-row sublane slice
        per_head = []
        for hi in range(HEADS):
            q = q_h[hi][r0:r0 + NTOK_PAD, :]
            k = k_h[hi][r0:r0 + NTOK_PAD, :]
            v = v_h[hi][r0:r0 + NTOK_PAD, :]
            s = jnp.einsum("qd,kd->qk", q, k,
                           preferred_element_type=jnp.float32) * SCALE + pad_mask
            s = s - jnp.max(s, axis=-1, keepdims=True)
            p = jnp.exp(s)
            p = p * pl.reciprocal(jnp.sum(p, axis=-1, keepdims=True), approx=True)
            per_head.append(jnp.dot(p.astype(jnp.bfloat16), v,
                                    preferred_element_type=jnp.float32))
        batch_out.append(jnp.concatenate(per_head, axis=-1))      # (NTOK_PAD, D)

    # heads/batches assembled once -> single (BN, D) @ (D, D) proj matmul
    attn_in = jnp.concatenate(batch_out, axis=0).astype(jnp.bfloat16)
    attn = jnp.dot(attn_in, projw_ref[0],
                   preferred_element_type=jnp.float32) + projb_ref[0]
    x = x + attn

    # MLP
    h2 = _layernorm(x, ln[2:3, :], ln[3:4, :])
    m = jnp.dot(h2.astype(jnp.bfloat16), fc1w_ref[0],
                preferred_element_type=jnp.float32) + fc1b_ref[0]
    m = _gelu_exact(m)
    m = jnp.dot(m.astype(jnp.bfloat16), fc2w_ref[0],
                preferred_element_type=jnp.float32) + fc2b_ref[0]
    x = x + m
    tok_ref[...] = x

    # ---- last grid step: gather only the B CLS rows, then LN + head ----
    @pl.when(l == DEPTH - 1)
    def _():
        cls_rows = jnp.concatenate(
            [x[b * NTOK_PAD:b * NTOK_PAD + 1, :] for b in range(B)], axis=0)   # (B, D)
        y = _layernorm(cls_rows, lnf_ref[0:1, :], lnf_ref[1:2, :])
        o_ref[...] = (jnp.dot(y, headw_ref[...],
                              preferred_element_type=jnp.float32) + headb_ref[...])


# ----------------------------- wrapper -----------------------------

def vit_regressor_forward(x, params):
    """x: (B, C, H, W) float32 (NCHW, like PyTorch). Returns (B, 1)."""
    B = x.shape[0]
    Hp = IMG // PATCH
    # non-overlapping-conv patch extraction, folded over the batch (B*NP rows)
    patches = (x.reshape(B, CH, Hp, PATCH, Hp, PATCH)
                 .transpose(0, 2, 4, 1, 3, 5)
                 .reshape(B * NUM_PATCHES, PATCH_DIM))

    bf = jnp.bfloat16
    qkv_w = params["qkv_w"].astype(bf)        # bf16 weight DMA (f32 accumulate on MXU)
    proj_w = params["proj_w"].astype(bf)
    fc1_w = params["fc1_w"].astype(bf)
    fc2_w = params["fc2_w"].astype(bf)

    const2 = lambda l: (0, 0)
    per_layer = lambda l: (l, 0, 0)

    grid_spec = pltpu.PrefetchScalarGridSpec(
        num_scalar_prefetch=0,
        grid=(DEPTH,),
        in_specs=[
            pl.BlockSpec((B * NUM_PATCHES, PATCH_DIM), const2),     # patches
            pl.BlockSpec((1, EMBED), const2),                       # cls
            pl.BlockSpec((NTOK, EMBED), const2),                    # pos
            pl.BlockSpec((PATCH_DIM, EMBED), const2),               # patch_w
            pl.BlockSpec((1, EMBED), const2),                       # patch_b
            pl.BlockSpec((1, 4, EMBED), per_layer),                 # lns
            pl.BlockSpec((1, EMBED, 3 * EMBED), per_layer),         # qkv_w  (bf16)
            pl.BlockSpec((1, 1, 3 * EMBED), per_layer),             # qkv_b
            pl.BlockSpec((1, EMBED, EMBED), per_layer),             # proj_w (bf16)
            pl.BlockSpec((1, 1, EMBED), per_layer),                 # proj_b
            pl.BlockSpec((1, EMBED, MLP), per_layer),               # fc1_w  (bf16)
            pl.BlockSpec((1, 1, MLP), per_layer),                   # fc1_b
            pl.BlockSpec((1, MLP, EMBED), per_layer),               # fc2_w  (bf16)
            pl.BlockSpec((1, 1, EMBED), per_layer),                 # fc2_b
            pl.BlockSpec((2, EMBED), const2),                       # lnf
            pl.BlockSpec((EMBED, 1), const2),                       # head_w
            pl.BlockSpec((1, 1), const2),                           # head_b
        ],
        out_specs=pl.BlockSpec((B, 1), const2),
        scratch_shapes=[pltpu.VMEM((B * NTOK_PAD, EMBED), jnp.float32)],
    )

    return pl.pallas_call(
        fused_vit_kernel,
        out_shape=jax.ShapeDtypeStruct((B, 1), jnp.float32),
        grid_spec=grid_spec,
        compiler_params=pltpu.CompilerParams(
            dimension_semantics=("arbitrary",),
            vmem_limit_bytes=64 * 1024 * 1024),
    )(patches, params["cls"], params["pos"],
      params["patch_w"], params["patch_b"],
      params["lns"], qkv_w, params["qkv_b"],
      proj_w, params["proj_b"],
      fc1_w, params["fc1_b"], fc2_w, params["fc2_b"],
      params["lnf"], params["head_w"], params["head_b"])


# ----------------------------- pure-JAX reference -----------------------------

def _ln_ref(v, g, b):
    mu = v.mean(-1, keepdims=True)
    var = ((v - mu) ** 2).mean(-1, keepdims=True)
    return (v - mu) * jax.lax.rsqrt(var + EPS) * g + b


def vit_ref(x, params):
    B = x.shape[0]
    Hp = IMG // PATCH
    patches = (x.reshape(B, CH, Hp, PATCH, Hp, PATCH)
                 .transpose(0, 2, 4, 1, 3, 5)
                 .reshape(B, NUM_PATCHES, PATCH_DIM))
    t = patches @ params["patch_w"] + params["patch_b"]
    cls = jnp.broadcast_to(params["cls"][None], (B, 1, EMBED))
    t = jnp.concatenate([cls, t], axis=1) + params["pos"][None]
    for l in range(DEPTH):
        g1, b1, g2, b2 = (params["lns"][l, i] for i in range(4))
        h = _ln_ref(t, g1, b1)
        qkv = h @ params["qkv_w"][l] + params["qkv_b"][l]
        q, k, v = jnp.split(qkv, 3, axis=-1)
        q = q.reshape(B, NTOK, HEADS, HEAD_DIM)
        k = k.reshape(B, NTOK, HEADS, HEAD_DIM)
        v = v.reshape(B, NTOK, HEADS, HEAD_DIM)
        s = jnp.einsum("bnhd,bmhd->bhnm", q, k) * SCALE
        p = jax.nn.softmax(s, axis=-1)
        o = jnp.einsum("bhnm,bmhd->bnhd", p, v).reshape(B, NTOK, EMBED)
        t = t + (o @ params["proj_w"][l] + params["proj_b"][l])
        h2 = _ln_ref(t, g2, b2)
        m = h2 @ params["fc1_w"][l] + params["fc1_b"][l]
        m = 0.5 * m * (1.0 + jax.lax.erf(m / math.sqrt(2.0)))
        t = t + (m @ params["fc2_w"][l] + params["fc2_b"][l])
    cls_t = _ln_ref(t[:, 0, :], params["lnf"][0], params["lnf"][1])
    return cls_t @ params["head_w"] + params["head_b"]


# ----------------------------- parameter init -----------------------------

def init_params(key):
    ks = iter(jax.random.split(key, 32))

    def nrm(shape, s=0.02):
        return jax.random.normal(next(ks), shape, jnp.float32) * s

    # per-block LayerNorm vectors packed: [ln1_g, ln1_b, ln2_g, ln2_b]
    lns = jnp.concatenate([
        1.0 + nrm((DEPTH, 1, EMBED), 0.05),
        nrm((DEPTH, 1, EMBED), 0.05),
        1.0 + nrm((DEPTH, 1, EMBED), 0.05),
        nrm((DEPTH, 1, EMBED), 0.05),
    ], axis=1)
    lnf = jnp.concatenate([1.0 + nrm((1, EMBED), 0.05),
                           nrm((1, EMBED), 0.05)], axis=0)

    return {
        "patch_w": nrm((PATCH_DIM, EMBED)),
        "patch_b": nrm((1, EMBED)),
        "cls": nrm((1, EMBED)),
        "pos": nrm((NTOK, EMBED)),
        "lns": lns,                                    # (DEPTH, 4, D)
        "qkv_w": nrm((DEPTH, EMBED, 3 * EMBED)),
        "qkv_b": nrm((DEPTH, 1, 3 * EMBED)),
        "proj_w": nrm((DEPTH, EMBED, EMBED)),
        "proj_b": nrm((DEPTH, 1, EMBED)),
        "fc1_w": nrm((DEPTH, EMBED, MLP)),
        "fc1_b": nrm((DEPTH, 1, MLP)),
        "fc2_w": nrm((DEPTH, MLP, EMBED)),
        "fc2_b": nrm((DEPTH, 1, EMBED)),
        "lnf": lnf,                                    # (2, D): gamma, beta
        "head_w": nrm((EMBED, 1)),
        "head_b": nrm((1, 1)),
    }


# ----------------------------- main -----------------------------

if __name__ == "__main__":
    key = jax.random.PRNGKey(0)
    pkey, xkey = jax.random.split(key)
    params = init_params(pkey)

    B = 2
    x = jax.random.normal(xkey, (B, CH, IMG, IMG), jnp.float32)  # NCHW

    forward = jax.jit(vit_regressor_forward)
    out = jax.block_until_ready(forward(x, params))
    assert out.shape == (B, 1), out.shape

    ref = jax.block_until_ready(vit_ref(x, params))
    # tolerance accounts for bf16 MXU operands + EUP approx reciprocal in softmax
    assert jnp.allclose(out, ref, atol=2e-2, rtol=2e-2), (out, ref)

    print("KERNEL_OK")
</pallas_src>

<mosaic_0001>
module attributes {stable_mosaic.version = 11 : i64} {
  func.func @fused_vit_kernel(%arg0: i32, %arg1: memref<8x192xf32, #tpu.memory_space<vmem>>, %arg2: memref<1x32xf32, #tpu.memory_space<vmem>>, %arg3: memref<5x32xf32, #tpu.memory_space<vmem>>, %arg4: memref<192x32xf32, #tpu.memory_space<vmem>>, %arg5: memref<1x32xf32, #tpu.memory_space<vmem>>, %arg6: memref<1x4x32xf32, #tpu.memory_space<vmem>>, %arg7: memref<1x32x96xbf16, #tpu.memory_space<vmem>>, %arg8: memref<1x1x96xf32, #tpu.memory_space<vmem>>, %arg9: memref<1x32x32xbf16, #tpu.memory_space<vmem>>, %arg10: memref<1x1x32xf32, #tpu.memory_space<vmem>>, %arg11: memref<1x32x128xbf16, #tpu.memory_space<vmem>>, %arg12: memref<1x1x128xf32, #tpu.memory_space<vmem>>, %arg13: memref<1x128x32xbf16, #tpu.memory_space<vmem>>, %arg14: memref<1x1x32xf32, #tpu.memory_space<vmem>>, %arg15: memref<2x32xf32, #tpu.memory_space<vmem>>, %arg16: memref<32x1xf32, #tpu.memory_space<vmem>>, %arg17: memref<1x1xf32, #tpu.memory_space<vmem>>, %arg18: memref<2x1xf32, #tpu.memory_space<vmem>>, %arg19: memref<16x32xf32, #tpu.memory_space<vmem>>) attributes {dimension_semantics = [#tpu.dimension_semantics<arbitrary>], iteration_bounds = array<i64: 2>, scalar_prefetch = 0 : i64, scratch_operands = 1 : i64, tpu.core_type = #tpu.core_type<tc>, window_params = [{pipeline_mode = #tpu.pipeline_mode<synchronous>, transform_indices = @transform_0, window_bounds = array<i64: 8, 192>}, {pipeline_mode = #tpu.pipeline_mode<synchronous>, transform_indices = @transform_1, window_bounds = array<i64: 1, 32>}, {pipeline_mode = #tpu.pipeline_mode<synchronous>, transform_indices = @transform_2, window_bounds = array<i64: 5, 32>}, {pipeline_mode = #tpu.pipeline_mode<synchronous>, transform_indices = @transform_3, window_bounds = array<i64: 192, 32>}, {pipeline_mode = #tpu.pipeline_mode<synchronous>, transform_indices = @transform_4, window_bounds = array<i64: 1, 32>}, {transform_indices = @transform_5, window_bounds = array<i64: 1, 4, 32>}, {transform_indices = @transform_6, window_bounds = array<i64: 1, 32, 96>}, {transform_indices = @transform_7, window_bounds = array<i64: 1, 1, 96>}, {transform_indices = @transform_8, window_bounds = array<i64: 1, 32, 32>}, {transform_indices = @transform_9, window_bounds = array<i64: 1, 1, 32>}, {transform_indices = @transform_10, window_bounds = array<i64: 1, 32, 128>}, {transform_indices = @transform_11, window_bounds = array<i64: 1, 1, 128>}, {transform_indices = @transform_12, window_bounds = array<i64: 1, 128, 32>}, {transform_indices = @transform_13, window_bounds = array<i64: 1, 1, 32>}, {pipeline_mode = #tpu.pipeline_mode<synchronous>, transform_indices = @transform_14, window_bounds = array<i64: 2, 32>}, {pipeline_mode = #tpu.pipeline_mode<synchronous>, transform_indices = @transform_15, window_bounds = array<i64: 32, 1>}, {pipeline_mode = #tpu.pipeline_mode<synchronous>, transform_indices = @transform_16, window_bounds = array<i64: 1, 1>}, {pipeline_mode = #tpu.pipeline_mode<synchronous>, transform_indices = @transform_17, window_bounds = array<i64: 2, 1>}]} {
    %c0_i32 = arith.constant 0 : i32
    %0 = arith.cmpi eq, %arg0, %c0_i32 : i32
    %1 = arith.extui %0 : i1 to i32
    %c0_i32_0 = arith.constant 0 : i32
    %2 = arith.cmpi ne, %1, %c0_i32_0 : i32
    scf.if %2 {
      %c0_156 = arith.constant 0 : index
      %c0_157 = arith.constant 0 : index
      %354 = vector.load %arg1[%c0_156, %c0_157] : memref<8x192xf32, #tpu.memory_space<vmem>>, vector<8x192xf32>
      %c0_158 = arith.constant 0 : index
      %c0_159 = arith.constant 0 : index
      %355 = vector.load %arg4[%c0_158, %c0_159] : memref<192x32xf32, #tpu.memory_space<vmem>>, vector<192x32xf32>
      %cst_160 = arith.constant dense<0.000000e+00> : vector<8x32xf32>
      %356 = tpu.matmul %354, %355, %cst_160 {dimension_numbers = #tpu.dot_dimension_numbers<[1], [0], [0], [1], [0, 0, 1, 1], [], []>} : vector<8x192xf32>, vector<192x32xf32>, vector<8x32xf32> -> vector<8x32xf32>
      %c0_161 = arith.constant 0 : index
      %c0_162 = arith.constant 0 : index
      %357 = vector.load %arg5[%c0_161, %c0_162] : memref<1x32xf32, #tpu.memory_space<vmem>>, vector<1x32xf32>
      %358 = vector.broadcast %357 : vector<1x32xf32> to vector<8x32xf32>
      %359 = arith.addf %356, %358 : vector<8x32xf32>
      %c0_163 = arith.constant 0 : index
      %c0_164 = arith.constant 0 : index
      %360 = vector.load %arg2[%c0_163, %c0_164] : memref<1x32xf32, #tpu.memory_space<vmem>>, vector<1x32xf32>
      %c0_165 = arith.constant 0 : index
      %c0_166 = arith.constant 0 : index
      %361 = vector.load %arg3[%c0_165, %c0_166] : memref<5x32xf32, #tpu.memory_space<vmem>>, vector<1x32xf32>
      %362 = arith.addf %360, %361 : vector<1x32xf32>
      %c1 = arith.constant 1 : index
      %c0_167 = arith.constant 0 : index
      %363 = vector.load %arg3[%c1, %c0_167] : memref<5x32xf32, #tpu.memory_space<vmem>>, vector<4x32xf32>
      %cst_168 = arith.constant 0.000000e+00 : f32
      %364 = vector.broadcast %cst_168 : f32 to vector<3x32xf32>
      %365 = vector.extract_strided_slice %359 {offsets = [0, 0], sizes = [4, 32], strides = [1, 1]} : vector<8x32xf32> to vector<4x32xf32>
      %366 = arith.addf %365, %363 : vector<4x32xf32>
      %367 = vector.extract_strided_slice %359 {offsets = [4, 0], sizes = [4, 32], strides = [1, 1]} : vector<8x32xf32> to vector<4x32xf32>
      %368 = arith.addf %367, %363 : vector<4x32xf32>
      %369 = tpu.concatenate %362, %366, %364, %362, %368, %364 in 0 : vector<1x32xf32>, vector<4x32xf32>, vector<3x32xf32>, vector<1x32xf32>, vector<4x32xf32>, vector<3x32xf32> -> vector<16x32xf32>
      %c0_169 = arith.constant 0 : index
      %c0_170 = arith.constant 0 : index
      %370 = vector.load %arg19[%c0_169, %c0_170] : memref<16x32xf32, #tpu.memory_space<vmem>>, vector<16x32xf32>
      tpu.vector_store %arg19[%c0_169, %c0_170], %369 {strides = array<i32>} : memref<16x32xf32, #tpu.memory_space<vmem>>, vector<16x32xf32>,
    } else {
    }
    %3 = tpu.iota {dimensions = array<i32: 1>} : vector<8x8xi32>
    %c5_i32 = arith.constant 5 : i32
    %4 = vector.broadcast %c5_i32 : i32 to vector<8x8xi32>
    %5 = arith.cmpi slt, %3, %4 : vector<8x8xi32>
    %cst = arith.constant 0.000000e+00 : f32
    %cst_1 = arith.constant -1.000000e+30 : f32
    %6 = vector.broadcast %cst : f32 to vector<8x8xf32>
    %7 = vector.broadcast %cst_1 : f32 to vector<8x8xf32>
    %8 = arith.select %5, %6, %7 : vector<8x8xi1>, vector<8x8xf32>
    %c0 = arith.constant 0 : index
    %c0_2 = arith.constant 0 : index
    %9 = vector.load %arg19[%c0, %c0_2] : memref<16x32xf32, #tpu.memory_space<vmem>>, vector<16x32xf32>
    %c0_3 = arith.constant 0 : index
    %c0_4 = arith.constant 0 : index
    %c0_5 = arith.constant 0 : index
    %10 = vector.load %arg6[%c0_3, %c0_4, %c0_5] : memref<1x4x32xf32, #tpu.memory_space<vmem>>, vector<1x4x32xf32>
    %11 = vector.shape_cast %10 : vector<1x4x32xf32> to vector<4x32xf32>
    %12 = vector.extract_strided_slice %11 {offsets = [0, 0], sizes = [1, 32], strides = [1, 1]} : vector<4x32xf32> to vector<1x32xf32>
    %13 = vector.extract_strided_slice %11 {offsets = [1, 0], sizes = [1, 32], strides = [1, 1]} : vector<4x32xf32> to vector<1x32xf32>
    %cst_6 = arith.constant dense<0.000000e+00> : vector<16xf32>
    %14 = vector.multi_reduction <add>, %9, %cst_6 [1] : vector<16x32xf32> to vector<16xf32>
    %15 = vector.shape_cast %14 : vector<16xf32> to vector<16x1xf32>
    %cst_7 = arith.constant 3.200000e+01 : f32
    %16 = vector.broadcast %cst_7 : f32 to vector<16x1xf32>
    %17 = arith.divf %15, %16 : vector<16x1xf32>
    %18 = vector.broadcast %17 : vector<16x1xf32> to vector<16x32xf32>
    %19 = arith.subf %9, %18 : vector<16x32xf32>
    %20 = vector.broadcast %17 : vector<16x1xf32> to vector<16x32xf32>
    %21 = arith.subf %9, %20 : vector<16x32xf32>
    %22 = arith.mulf %19, %21 : vector<16x32xf32>
    %cst_8 = arith.constant dense<0.000000e+00> : vector<16xf32>
    %23 = vector.multi_reduction <add>, %22, %cst_8 [1] : vector<16x32xf32> to vector<16xf32>
    %24 = vector.shape_cast %23 : vector<16xf32> to vector<16x1xf32>
    %cst_9 = arith.constant 3.200000e+01 : f32
    %25 = vector.broadcast %cst_9 : f32 to vector<16x1xf32>
    %26 = arith.divf %24, %25 : vector<16x1xf32>
    %27 = vector.broadcast %17 : vector<16x1xf32> to vector<16x32xf32>
    %28 = arith.subf %9, %27 : vector<16x32xf32>
    %cst_10 = arith.constant 9.99999997E-7 : f32
    %29 = vector.broadcast %cst_10 : f32 to vector<16x1xf32>
    %30 = arith.addf %26, %29 : vector<16x1xf32>
    %31 = math.rsqrt %30 : vector<16x1xf32>
    %32 = vector.broadcast %31 : vector<16x1xf32> to vector<16x32xf32>
    %33 = arith.mulf %28, %32 : vector<16x32xf32>
    %34 = vector.broadcast %12 : vector<1x32xf32> to vector<16x32xf32>
    %35 = arith.mulf %33, %34 : vector<16x32xf32>
    %36 = vector.broadcast %13 : vector<1x32xf32> to vector<16x32xf32>
    %37 = arith.addf %35, %36 : vector<16x32xf32>
    %38 = arith.truncf %37 : vector<16x32xf32> to vector<16x32xbf16>
    %c0_11 = arith.constant 0 : index
    %c0_12 = arith.constant 0 : index
    %c0_13 = arith.constant 0 : index
    %39 = vector.load %arg7[%c0_11, %c0_12, %c0_13] : memref<1x32x96xbf16, #tpu.memory_space<vmem>>, vector<1x32x8xbf16>
    %40 = vector.shape_cast %39 : vector<1x32x8xbf16> to vector<32x8xbf16>
    %c0_14 = arith.constant 0 : index
    %c0_15 = arith.constant 0 : index
    %c32 = arith.constant 32 : index
    %41 = vector.load %arg7[%c0_14, %c0_15, %c32] : memref<1x32x96xbf16, #tpu.memory_space<vmem>>, vector<1x32x8xbf16>
    %42 = vector.shape_cast %41 : vector<1x32x8xbf16> to vector<32x8xbf16>
    %c0_16 = arith.constant 0 : index
    %c0_17 = arith.constant 0 : index
    %c64 = arith.constant 64 : index
    %43 = vector.load %arg7[%c0_16, %c0_17, %c64] : memref<1x32x96xbf16, #tpu.memory_space<vmem>>, vector<1x32x8xbf16>
    %44 = vector.shape_cast %43 : vector<1x32x8xbf16> to vector<32x8xbf16>
    %c0_18 = arith.constant 0 : index
    %c0_19 = arith.constant 0 : index
    %c0_20 = arith.constant 0 : index
    %45 = vector.load %arg8[%c0_18, %c0_19, %c0_20] : memref<1x1x96xf32, #tpu.memory_space<vmem>>, vector<1x1x8xf32>
    %46 = vector.shape_cast %45 : vector<1x1x8xf32> to vector<1x8xf32>
    %c0_21 = arith.constant 0 : index
    %c0_22 = arith.constant 0 : index
    %c32_23 = arith.constant 32 : index
    %47 = vector.load %arg8[%c0_21, %c0_22, %c32_23] : memref<1x1x96xf32, #tpu.memory_space<vmem>>, vector<1x1x8xf32>
    %48 = vector.shape_cast %47 : vector<1x1x8xf32> to vector<1x8xf32>
    %c0_24 = arith.constant 0 : index
    %c0_25 = arith.constant 0 : index
    %c64_26 = arith.constant 64 : index
    %49 = vector.load %arg8[%c0_24, %c0_25, %c64_26] : memref<1x1x96xf32, #tpu.memory_space<vmem>>, vector<1x1x8xf32>
    %50 = vector.shape_cast %49 : vector<1x1x8xf32> to vector<1x8xf32>
    %cst_27 = arith.constant dense<0.000000e+00> : vector<16x8xf32>
    %51 = tpu.matmul %38, %40, %cst_27 {dimension_numbers = #tpu.dot_dimension_numbers<[1], [0], [0], [1], [0, 0, 1, 1], [], []>} : vector<16x32xbf16>, vector<32x8xbf16>, vector<16x8xf32> -> vector<16x8xf32>
    %52 = vector.broadcast %46 : vector<1x8xf32> to vector<16x8xf32>
    %53 = arith.addf %51, %52 : vector<16x8xf32>
    %54 = arith.truncf %53 : vector<16x8xf32> to vector<16x8xbf16>
    %cst_28 = arith.constant dense<0.000000e+00> : vector<16x8xf32>
    %55 = tpu.matmul %38, %42, %cst_28 {dimension_numbers = #tpu.dot_dimension_numbers<[1], [0], [0], [1], [0, 0, 1, 1], [], []>} : vector<16x32xbf16>, vector<32x8xbf16>, vector<16x8xf32> -> vector<16x8xf32>
    %56 = vector.broadcast %48 : vector<1x8xf32> to vector<16x8xf32>
    %57 = arith.addf %55, %56 : vector<16x8xf32>
    %58 = arith.truncf %57 : vector<16x8xf32> to vector<16x8xbf16>
    %cst_29 = arith.constant dense<0.000000e+00> : vector<16x8xf32>
    %59 = tpu.matmul %38, %44, %cst_29 {dimension_numbers = #tpu.dot_dimension_numbers<[1], [0], [0], [1], [0, 0, 1, 1], [], []>} : vector<16x32xbf16>, vector<32x8xbf16>, vector<16x8xf32> -> vector<16x8xf32>
    %60 = vector.broadcast %50 : vector<1x8xf32> to vector<16x8xf32>
    %61 = arith.addf %59, %60 : vector<16x8xf32>
    %62 = arith.truncf %61 : vector<16x8xf32> to vector<16x8xbf16>
    %c0_30 = arith.constant 0 : index
    %c0_31 = arith.constant 0 : index
    %c8 = arith.constant 8 : index
    %63 = vector.load %arg7[%c0_30, %c0_31, %c8] : memref<1x32x96xbf16, #tpu.memory_space<vmem>>, vector<1x32x8xbf16>
    %64 = vector.shape_cast %63 : vector<1x32x8xbf16> to vector<32x8xbf16>
    %c0_32 = arith.constant 0 : index
    %c0_33 = arith.constant 0 : index
    %c40 = arith.constant 40 : index
    %65 = vector.load %arg7[%c0_32, %c0_33, %c40] : memref<1x32x96xbf16, #tpu.memory_space<vmem>>, vector<1x32x8xbf16>
    %66 = vector.shape_cast %65 : vector<1x32x8xbf16> to vector<32x8xbf16>
    %c0_34 = arith.constant 0 : index
    %c0_35 = arith.constant 0 : index
    %c72 = arith.constant 72 : index
    %67 = vector.load %arg7[%c0_34, %c0_35, %c72] : memref<1x32x96xbf16, #tpu.memory_space<vmem>>, vector<1x32x8xbf16>
    %68 = vector.shape_cast %67 : vector<1x32x8xbf16> to vector<32x8xbf16>
    %c0_36 = arith.constant 0 : index
    %c0_37 = arith.constant 0 : index
    %c8_38 = arith.constant 8 : index
    %69 = vector.load %arg8[%c0_36, %c0_37, %c8_38] : memref<1x1x96xf32, #tpu.memory_space<vmem>>, vector<1x1x8xf32>
    %70 = vector.shape_cast %69 : vector<1x1x8xf32> to vector<1x8xf32>
    %c0_39 = arith.constant 0 : index
    %c0_40 = arith.constant 0 : index
    %c40_41 = arith.constant 40 : index
    %71 = vector.load %arg8[%c0_39, %c0_40, %c40_41] : memref<1x1x96xf32, #tpu.memory_space<vmem>>, vector<1x1x8xf32>
    %72 = vector.shape_cast %71 : vector<1x1x8xf32> to vector<1x8xf32>
    %c0_42 = arith.constant 0 : index
    %c0_43 = arith.constant 0 : index
    %c72_44 = arith.constant 72 : index
    %73 = vector.load %arg8[%c0_42, %c0_43, %c72_44] : memref<1x1x96xf32, #tpu.memory_space<vmem>>, vector<1x1x8xf32>
    %74 = vector.shape_cast %73 : vector<1x1x8xf32> to vector<1x8xf32>
    %cst_45 = arith.constant dense<0.000000e+00> : vector<16x8xf32>
    %75 = tpu.matmul %38, %64, %cst_45 {dimension_numbers = #tpu.dot_dimension_numbers<[1], [0], [0], [1], [0, 0, 1, 1], [], []>} : vector<16x32xbf16>, vector<32x8xbf16>, vector<16x8xf32> -> vector<16x8xf32>
    %76 = vector.broadcast %70 : vector<1x8xf32> to vector<16x8xf32>
    %77 = arith.addf %75, %76 : vector<16x8xf32>
    %78 = arith.truncf %77 : vector<16x8xf32> to vector<16x8xbf16>
    %cst_46 = arith.constant dense<0.000000e+00> : vector<16x8xf32>
    %79 = tpu.matmul %38, %66, %cst_46 {dimension_numbers = #tpu.dot_dimension_numbers<[1], [0], [0], [1], [0, 0, 1, 1], [], []>} : vector<16x32xbf16>, vector<32x8xbf16>, vector<16x8xf32> -> vector<16x8xf32>
    %80 = vector.broadcast %72 : vector<1x8xf32> to vector<16x8xf32>
    %81 = arith.addf %79, %80 : vector<16x8xf32>
    %82 = arith.truncf %81 : vector<16x8xf32> to vector<16x8xbf16>
    %cst_47 = arith.constant dense<0.000000e+00> : vector<16x8xf32>
    %83 = tpu.matmul %38, %68, %cst_47 {dimension_numbers = #tpu.dot_dimension_numbers<[1], [0], [0], [1], [0, 0, 1, 1], [], []>} : vector<16x32xbf16>, vector<32x8xbf16>, vector<16x8xf32> -> vector<16x8xf32>
    %84 = vector.broadcast %74 : vector<1x8xf32> to vector<16x8xf32>
    %85 = arith.addf %83, %84 : vector<16x8xf32>
    %86 = arith.truncf %85 : vector<16x8xf32> to vector<16x8xbf16>
    %c0_48 = arith.constant 0 : index
    %c0_49 = arith.constant 0 : index
    %c16 = arith.constant 16 : index
    %87 = vector.load %arg7[%c0_48, %c0_49, %c16] : memref<1x32x96xbf16, #tpu.memory_space<vmem>>, vector<1x32x8xbf16>
    %88 = vector.shape_cast %87 : vector<1x32x8xbf16> to vector<32x8xbf16>
    %c0_50 = arith.constant 0 : index
    %c0_51 = arith.constant 0 : index
    %c48 = arith.constant 48 : index
    %89 = vector.load %arg7[%c0_50, %c0_51, %c48] : memref<1x32x96xbf16, #tpu.memory_space<vmem>>, vector<1x32x8xbf16>
    %90 = vector.shape_cast %89 : vector<1x32x8xbf16> to vector<32x8xbf16>
    %c0_52 = arith.constant 0 : index
    %c0_53 = arith.constant 0 : index
    %c80 = arith.constant 80 : index
    %91 = vector.load %arg7[%c0_52, %c0_53, %c80] : memref<1x32x96xbf16, #tpu.memory_space<vmem>>, vector<1x32x8xbf16>
    %92 = vector.shape_cast %91 : vector<1x32x8xbf16> to vector<32x8xbf16>
    %c0_54 = arith.constant 0 : index
    %c0_55 = arith.constant 0 : index
    %c16_56 = arith.constant 16 : index
    %93 = vector.load %arg8[%c0_54, %c0_55, %c16_56] : memref<1x1x96xf32, #tpu.memory_space<vmem>>, vector<1x1x8xf32>
    %94 = vector.shape_cast %93 : vector<1x1x8xf32> to vector<1x8xf32>
    %c0_57 = arith.constant 0 : index
    %c0_58 = arith.constant 0 : index
    %c48_59 = arith.constant 48 : index
    %95 = vector.load %arg8[%c0_57, %c0_58, %c48_59] : memref<1x1x96xf32, #tpu.memory_space<vmem>>, vector<1x1x8xf32>
    %96 = vector.shape_cast %95 : vector<1x1x8xf32> to vector<1x8xf32>
    %c0_60 = arith.constant 0 : index
    %c0_61 = arith.constant 0 : index
    %c80_62 = arith.constant 80 : index
    %97 = vector.load %arg8[%c0_60, %c0_61, %c80_62] : memref<1x1x96xf32, #tpu.memory_space<vmem>>, vector<1x1x8xf32>
    %98 = vector.shape_cast %97 : vector<1x1x8xf32> to vector<1x8xf32>
    %cst_63 = arith.constant dense<0.000000e+00> : vector<16x8xf32>
    %99 = tpu.matmul %38, %88, %cst_63 {dimension_numbers = #tpu.dot_dimension_numbers<[1], [0], [0], [1], [0, 0, 1, 1], [], []>} : vector<16x32xbf16>, vector<32x8xbf16>, vector<16x8xf32> -> vector<16x8xf32>
    %100 = vector.broadcast %94 : vector<1x8xf32> to vector<16x8xf32>
    %101 = arith.addf %99, %100 : vector<16x8xf32>
    %102 = arith.truncf %101 : vector<16x8xf32> to vector<16x8xbf16>
    %cst_64 = arith.constant dense<0.000000e+00> : vector<16x8xf32>
    %103 = tpu.matmul %38, %90, %cst_64 {dimension_numbers = #tpu.dot_dimension_numbers<[1], [0], [0], [1], [0, 0, 1, 1], [], []>} : vector<16x32xbf16>, vector<32x8xbf16>, vector<16x8xf32> -> vector<16x8xf32>
    %104 = vector.broadcast %96 : vector<1x8xf32> to vector<16x8xf32>
    %105 = arith.addf %103, %104 : vector<16x8xf32>
    %106 = arith.truncf %105 : vector<16x8xf32> to vector<16x8xbf16>
    %cst_65 = arith.constant dense<0.000000e+00> : vector<16x8xf32>
    %107 = tpu.matmul %38, %92, %cst_65 {dimension_numbers = #tpu.dot_dimension_numbers<[1], [0], [0], [1], [0, 0, 1, 1], [], []>} : vector<16x32xbf16>, vector<32x8xbf16>, vector<16x8xf32> -> vector<16x8xf32>
    %108 = vector.broadcast %98 : vector<1x8xf32> to vector<16x8xf32>
    %109 = arith.addf %107, %108 : vector<16x8xf32>
    %110 = arith.truncf %109 : vector<16x8xf32> to vector<16x8xbf16>
    %c0_66 = arith.constant 0 : index
    %c0_67 = arith.constant 0 : index
    %c24 = arith.constant 24 : index
    %111 = vector.load %arg7[%c0_66, %c0_67, %c24] : memref<1x32x96xbf16, #tpu.memory_space<vmem>>, vector<1x32x8xbf16>
    %112 = vector.shape_cast %111 : vector<1x32x8xbf16> to vector<32x8xbf16>
    %c0_68 = arith.constant 0 : index
    %c0_69 = arith.constant 0 : index
    %c56 = arith.constant 56 : index
    %113 = vector.load %arg7[%c0_68, %c0_69, %c56] : memref<1x32x96xbf16, #tpu.memory_space<vmem>>, vector<1x32x8xbf16>
    %114 = vector.shape_cast %113 : vector<1x32x8xbf16> to vector<32x8xbf16>
    %c0_70 = arith.constant 0 : index
    %c0_71 = arith.constant 0 : index
    %c88 = arith.constant 88 : index
    %115 = vector.load %arg7[%c0_70, %c0_71, %c88] : memref<1x32x96xbf16, #tpu.memory_space<vmem>>, vector<1x32x8xbf16>
    %116 = vector.shape_cast %115 : vector<1x32x8xbf16> to vector<32x8xbf16>
    %c0_72 = arith.constant 0 : index
    %c0_73 = arith.constant 0 : index
    %c24_74 = arith.constant 24 : index
    %117 = vector.load %arg8[%c0_72, %c0_73, %c24_74] : memref<1x1x96xf32, #tpu.memory_space<vmem>>, vector<1x1x8xf32>
    %118 = vector.shape_cast %117 : vector<1x1x8xf32> to vector<1x8xf32>
    %c0_75 = arith.constant 0 : index
    %c0_76 = arith.constant 0 : index
    %c56_77 = arith.constant 56 : index
    %119 = vector.load %arg8[%c0_75, %c0_76, %c56_77] : memref<1x1x96xf32, #tpu.memory_space<vmem>>, vector<1x1x8xf32>
    %120 = vector.shape_cast %119 : vector<1x1x8xf32> to vector<1x8xf32>
    %c0_78 = arith.constant 0 : index
    %c0_79 = arith.constant 0 : index
    %c88_80 = arith.constant 88 : index
    %121 = vector.load %arg8[%c0_78, %c0_79, %c88_80] : memref<1x1x96xf32, #tpu.memory_space<vmem>>, vector<1x1x8xf32>
    %122 = vector.shape_cast %121 : vector<1x1x8xf32> to vector<1x8xf32>
    %cst_81 = arith.constant dense<0.000000e+00> : vector<16x8xf32>
    %123 = tpu.matmul %38, %112, %cst_81 {dimension_numbers = #tpu.dot_dimension_numbers<[1], [0], [0], [1], [0, 0, 1, 1], [], []>} : vector<16x32xbf16>, vector<32x8xbf16>, vector<16x8xf32> -> vector<16x8xf32>
    %124 = vector.broadcast %118 : vector<1x8xf32> to vector<16x8xf32>
    %125 = arith.addf %123, %124 : vector<16x8xf32>
    %126 = arith.truncf %125 : vector<16x8xf32> to vector<16x8xbf16>
    %cst_82 = arith.constant dense<0.000000e+00> : vector<16x8xf32>
    %127 = tpu.matmul %38, %114, %cst_82 {dimension_numbers = #tpu.dot_dimension_numbers<[1], [0], [0], [1], [0, 0, 1, 1], [], []>} : vector<16x32xbf16>, vector<32x8xbf16>, vector<16x8xf32> -> vector<16x8xf32>
    %128 = vector.broadcast %120 : vector<1x8xf32> to vector<16x8xf32>
    %129 = arith.addf %127, %128 : vector<16x8xf32>
    %130 = arith.truncf %129 : vector<16x8xf32> to vector<16x8xbf16>
    %cst_83 = arith.constant dense<0.000000e+00> : vector<16x8xf32>
    %131 = tpu.matmul %38, %116, %cst_83 {dimension_numbers = #tpu.dot_dimension_numbers<[1], [0], [0], [1], [0, 0, 1, 1], [], []>} : vector<16x32xbf16>, vector<32x8xbf16>, vector<16x8xf32> -> vector<16x8xf32>
    %132 = vector.broadcast %122 : vector<1x8xf32> to vector<16x8xf32>
    %133 = arith.addf %131, %132 : vector<16x8xf32>
    %134 = arith.truncf %133 : vector<16x8xf32> to vector<16x8xbf16>
    %135 = vector.extract_strided_slice %54 {offsets = [0, 0], sizes = [8, 8], strides = [1, 1]} : vector<16x8xbf16> to vector<8x8xbf16>
    %136 = vector.extract_strided_slice %58 {offsets = [0, 0], sizes = [8, 8], strides = [1, 1]} : vector<16x8xbf16> to vector<8x8xbf16>
    %137 = vector.extract_strided_slice %62 {offsets = [0, 0], sizes = [8, 8], strides = [1, 1]} : vector<16x8xbf16> to vector<8x8xbf16>
    "tpu.trace_start"() <{level = 10 : i32, message = "qd,kd->qk"}> : () -> ()
    %cst_84 = arith.constant dense<0.000000e+00> : vector<8x8xf32>
    %138 = tpu.matmul %135, %136, %cst_84 {dimension_numbers = #tpu.dot_dimension_numbers<[1], [1], [0], [0], [0, 0, 1, 0], [], []>} : vector<8x8xbf16>, vector<8x8xbf16>, vector<8x8xf32> -> vector<8x8xf32>
    "tpu.trace_stop"() : () -> ()
    %cst_85 = arith.constant 0.353553385 : f32
    %139 = vector.broadcast %cst_85 : f32 to vector<8x8xf32>
    %140 = arith.mulf %138, %139 : vector<8x8xf32>
    %141 = arith.addf %140, %8 : vector<8x8xf32>
    %cst_86 = arith.constant dense<0xFF800000> : vector<8xf32>
    %142 = vector.multi_reduction <maximumf>, %141, %cst_86 [1] : vector<8x8xf32> to vector<8xf32>
    %143 = vector.shape_cast %142 : vector<8xf32> to vector<8x1xf32>
    %144 = vector.broadcast %143 : vector<8x1xf32> to vector<8x8xf32>
    %145 = arith.subf %141, %144 : vector<8x8xf32>
    %146 = math.exp %145 : vector<8x8xf32>
    %cst_87 = arith.constant dense<0.000000e+00> : vector<8xf32>
    %147 = vector.multi_reduction <add>, %146, %cst_87 [1] : vector<8x8xf32> to vector<8xf32>
    %148 = vector.shape_cast %147 : vector<8xf32> to vector<8x1xf32>
    %149 = tpu.reciprocal %148 {approx = true} : vector<8x1xf32> -> vector<8x1xf32>
    %150 = vector.broadcast %149 : vector<8x1xf32> to vector<8x8xf32>
    %151 = arith.mulf %146, %150 : vector<8x8xf32>
    %152 = arith.truncf %151 : vector<8x8xf32> to vector<8x8xbf16>
    %cst_88 = arith.constant dense<0.000000e+00> : vector<8x8xf32>
    %153 = tpu.matmul %152, %137, %cst_88 {dimension_numbers = #tpu.dot_dimension_numbers<[1], [0], [0], [1], [0, 0, 1, 1], [], []>} : vector<8x8xbf16>, vector<8x8xbf16>, vector<8x8xf32> -> vector<8x8xf32>
    %154 = vector.extract_strided_slice %78 {offsets = [0, 0], sizes = [8, 8], strides = [1, 1]} : vector<16x8xbf16> to vector<8x8xbf16>
    %155 = vector.extract_strided_slice %82 {offsets = [0, 0], sizes = [8, 8], strides = [1, 1]} : vector<16x8xbf16> to vector<8x8xbf16>
    %156 = vector.extract_strided_slice %86 {offsets = [0, 0], sizes = [8, 8], strides = [1, 1]} : vector<16x8xbf16> to vector<8x8xbf16>
    "tpu.trace_start"() <{level = 10 : i32, message = "qd,kd->qk"}> : () -> ()
    %cst_89 = arith.constant dense<0.000000e+00> : vector<8x8xf32>
    %157 = tpu.matmul %154, %155, %cst_89 {dimension_numbers = #tpu.dot_dimension_numbers<[1], [1], [0], [0], [0, 0, 1, 0], [], []>} : vector<8x8xbf16>, vector<8x8xbf16>, vector<8x8xf32> -> vector<8x8xf32>
    "tpu.trace_stop"() : () -> ()
    %cst_90 = arith.constant 0.353553385 : f32
    %158 = vector.broadcast %cst_90 : f32 to vector<8x8xf32>
    %159 = arith.mulf %157, %158 : vector<8x8xf32>
    %160 = arith.addf %159, %8 : vector<8x8xf32>
    %cst_91 = arith.constant dense<0xFF800000> : vector<8xf32>
    %161 = vector.multi_reduction <maximumf>, %160, %cst_91 [1] : vector<8x8xf32> to vector<8xf32>
    %162 = vector.shape_cast %161 : vector<8xf32> to vector<8x1xf32>
    %163 = vector.broadcast %162 : vector<8x1xf32> to vector<8x8xf32>
    %164 = arith.subf %160, %163 : vector<8x8xf32>
    %165 = math.exp %164 : vector<8x8xf32>
    %cst_92 = arith.constant dense<0.000000e+00> : vector<8xf32>
    %166 = vector.multi_reduction <add>, %165, %cst_92 [1] : vector<8x8xf32> to vector<8xf32>
    %167 = vector.shape_cast %166 : vector<8xf32> to vector<8x1xf32>
    %168 = tpu.reciprocal %167 {approx = true} : vector<8x1xf32> -> vector<8x1xf32>
    %169 = vector.broadcast %168 : vector<8x1xf32> to vector<8x8xf32>
    %170 = arith.mulf %165, %169 : vector<8x8xf32>
    %171 = arith.truncf %170 : vector<8x8xf32> to vector<8x8xbf16>
    %cst_93 = arith.constant dense<0.000000e+00> : vector<8x8xf32>
    %172 = tpu.matmul %171, %156, %cst_93 {dimension_numbers = #tpu.dot_dimension_numbers<[1], [0], [0], [1], [0, 0, 1, 1], [], []>} : vector<8x8xbf16>, vector<8x8xbf16>, vector<8x8xf32> -> vector<8x8xf32>
    %173 = vector.extract_strided_slice %102 {offsets = [0, 0], sizes = [8, 8], strides = [1, 1]} : vector<16x8xbf16> to vector<8x8xbf16>
    %174 = vector.extract_strided_slice %106 {offsets = [0, 0], sizes = [8, 8], strides = [1, 1]} : vector<16x8xbf16> to vector<8x8xbf16>
    %175 = vector.extract_strided_slice %110 {offsets = [0, 0], sizes = [8, 8], strides = [1, 1]} : vector<16x8xbf16> to vector<8x8xbf16>
    "tpu.trace_start"() <{level = 10 : i32, message = "qd,kd->qk"}> : () -> ()
    %cst_94 = arith.constant dense<0.000000e+00> : vector<8x8xf32>
    %176 = tpu.matmul %173, %174, %cst_94 {dimension_numbers = #tpu.dot_dimension_numbers<[1], [1], [0], [0], [0, 0, 1, 0], [], []>} : vector<8x8xbf16>, vector<8x8xbf16>, vector<8x8xf32> -> vector<8x8xf32>
    "tpu.trace_stop"() : () -> ()
    %cst_95 = arith.constant 0.353553385 : f32
    %177 = vector.broadcast %cst_95 : f32 to vector<8x8xf32>
    %178 = arith.mulf %176, %177 : vector<8x8xf32>
    %179 = arith.addf %178, %8 : vector<8x8xf32>
    %cst_96 = arith.constant dense<0xFF800000> : vector<8xf32>
    %180 = vector.multi_reduction <maximumf>, %179, %cst_96 [1] : vector<8x8xf32> to vector<8xf32>
    %181 = vector.shape_cast %180 : vector<8xf32> to vector<8x1xf32>
    %182 = vector.broadcast %181 : vector<8x1xf32> to vector<8x8xf32>
    %183 = arith.subf %179, %182 : vector<8x8xf32>
    %184 = math.exp %183 : vector<8x8xf32>
    %cst_97 = arith.constant dense<0.000000e+00> : vector<8xf32>
    %185 = vector.multi_reduction <add>, %184, %cst_97 [1] : vector<8x8xf32> to vector<8xf32>
    %186 = vector.shape_cast %185 : vector<8xf32> to vector<8x1xf32>
    %187 = tpu.reciprocal %186 {approx = true} : vector<8x1xf32> -> vector<8x1xf32>
    %188 = vector.broadcast %187 : vector<8x1xf32> to vector<8x8xf32>
    %189 = arith.mulf %184, %188 : vector<8x8xf32>
    %190 = arith.truncf %189 : vector<8x8xf32> to vector<8x8xbf16>
    %cst_98 = arith.constant dense<0.000000e+00> : vector<8x8xf32>
    %191 = tpu.matmul %190, %175, %cst_98 {dimension_numbers = #tpu.dot_dimension_numbers<[1], [0], [0], [1], [0, 0, 1, 1], [], []>} : vector<8x8xbf16>, vector<8x8xbf16>, vector<8x8xf32> -> vector<8x8xf32>
    %192 = vector.extract_strided_slice %126 {offsets = [0, 0], sizes = [8, 8], strides = [1, 1]} : vector<16x8xbf16> to vector<8x8xbf16>
    %193 = vector.extract_strided_slice %130 {offsets = [0, 0], sizes = [8, 8], strides = [1, 1]} : vector<16x8xbf16> to vector<8x8xbf16>
    %194 = vector.extract_strided_slice %134 {offsets = [0, 0], sizes = [8, 8], strides = [1, 1]} : vector<16x8xbf16> to vector<8x8xbf16>
    "tpu.trace_start"() <{level = 10 : i32, message = "qd,kd->qk"}> : () -> ()
    %cst_99 = arith.constant dense<0.000000e+00> : vector<8x8xf32>
    %195 = tpu.matmul %192, %193, %cst_99 {dimension_numbers = #tpu.dot_dimension_numbers<[1], [1], [0], [0], [0, 0, 1, 0], [], []>} : vector<8x8xbf16>, vector<8x8xbf16>, vector<8x8xf32> -> vector<8x8xf32>
    "tpu.trace_stop"() : () -> ()
    %cst_100 = arith.constant 0.353553385 : f32
    %196 = vector.broadcast %cst_100 : f32 to vector<8x8xf32>
    %197 = arith.mulf %195, %196 : vector<8x8xf32>
    %198 = arith.addf %197, %8 : vector<8x8xf32>
    %cst_101 = arith.constant dense<0xFF800000> : vector<8xf32>
    %199 = vector.multi_reduction <maximumf>, %198, %cst_101 [1] : vector<8x8xf32> to vector<8xf32>
    %200 = vector.shape_cast %199 : vector<8xf32> to vector<8x1xf32>
    %201 = vector.broadcast %200 : vector<8x1xf32> to vector<8x8xf32>
    %202 = arith.subf %198, %201 : vector<8x8xf32>
    %203 = math.exp %202 : vector<8x8xf32>
    %cst_102 = arith.constant dense<0.000000e+00> : vector<8xf32>
    %204 = vector.multi_reduction <add>, %203, %cst_102 [1] : vector<8x8xf32> to vector<8xf32>
    %205 = vector.shape_cast %204 : vector<8xf32> to vector<8x1xf32>
    %206 = tpu.reciprocal %205 {approx = true} : vector<8x1xf32> -> vector<8x1xf32>
    %207 = vector.broadcast %206 : vector<8x1xf32> to vector<8x8xf32>
    %208 = arith.mulf %203, %207 : vector<8x8xf32>
    %209 = arith.truncf %208 : vector<8x8xf32> to vector<8x8xbf16>
    %cst_103 = arith.constant dense<0.000000e+00> : vector<8x8xf32>
    %210 = tpu.matmul %209, %194, %cst_103 {dimension_numbers = #tpu.dot_dimension_numbers<[1], [0], [0], [1], [0, 0, 1, 1], [], []>} : vector<8x8xbf16>, vector<8x8xbf16>, vector<8x8xf32> -> vector<8x8xf32>
    %211 = tpu.concatenate %153, %172, %191, %210 in 1 : vector<8x8xf32>, vector<8x8xf32>, vector<8x8xf32>, vector<8x8xf32> -> vector<8x32xf32>
    %212 = vector.extract_strided_slice %54 {offsets = [8, 0], sizes = [8, 8], strides = [1, 1]} : vector<16x8xbf16> to vector<8x8xbf16>
    %213 = vector.extract_strided_slice %58 {offsets = [8, 0], sizes = [8, 8], strides = [1, 1]} : vector<16x8xbf16> to vector<8x8xbf16>
    %214 = vector.extract_strided_slice %62 {offsets = [8, 0], sizes = [8, 8], strides = [1, 1]} : vector<16x8xbf16> to vector<8x8xbf16>
    "tpu.trace_start"() <{level = 10 : i32, message = "qd,kd->qk"}> : () -> ()
    %cst_104 = arith.constant dense<0.000000e+00> : vector<8x8xf32>
    %215 = tpu.matmul %212, %213, %cst_104 {dimension_numbers = #tpu.dot_dimension_numbers<[1], [1], [0], [0], [0, 0, 1, 0], [], []>} : vector<8x8xbf16>, vector<8x8xbf16>, vector<8x8xf32> -> vector<8x8xf32>
    "tpu.trace_stop"() : () -> ()
    %cst_105 = arith.constant 0.353553385 : f32
    %216 = vector.broadcast %cst_105 : f32 to vector<8x8xf32>
    %217 = arith.mulf %215, %216 : vector<8x8xf32>
    %218 = arith.addf %217, %8 : vector<8x8xf32>
    %cst_106 = arith.constant dense<0xFF800000> : vector<8xf32>
    %219 = vector.multi_reduction <maximumf>, %218, %cst_106 [1] : vector<8x8xf32> to vector<8xf32>
    %220 = vector.shape_cast %219 : vector<8xf32> to vector<8x1xf32>
    %221 = vector.broadcast %220 : vector<8x1xf32> to vector<8x8xf32>
    %222 = arith.subf %218, %221 : vector<8x8xf32>
    %223 = math.exp %222 : vector<8x8xf32>
    %cst_107 = arith.constant dense<0.000000e+00> : vector<8xf32>
    %224 = vector.multi_reduction <add>, %223, %cst_107 [1] : vector<8x8xf32> to vector<8xf32>
    %225 = vector.shape_cast %224 : vector<8xf32> to vector<8x1xf32>
    %226 = tpu.reciprocal %225 {approx = true} : vector<8x1xf32> -> vector<8x1xf32>
    %227 = vector.broadcast %226 : vector<8x1xf32> to vector<8x8xf32>
    %228 = arith.mulf %223, %227 : vector<8x8xf32>
    %229 = arith.truncf %228 : vector<8x8xf32> to vector<8x8xbf16>
    %cst_108 = arith.constant dense<0.000000e+00> : vector<8x8xf32>
    %230 = tpu.matmul %229, %214, %cst_108 {dimension_numbers = #tpu.dot_dimension_numbers<[1], [0], [0], [1], [0, 0, 1, 1], [], []>} : vector<8x8xbf16>, vector<8x8xbf16>, vector<8x8xf32> -> vector<8x8xf32>
    %231 = vector.extract_strided_slice %78 {offsets = [8, 0], sizes = [8, 8], strides = [1, 1]} : vector<16x8xbf16> to vector<8x8xbf16>
    %232 = vector.extract_strided_slice %82 {offsets = [8, 0], sizes = [8, 8], strides = [1, 1]} : vector<16x8xbf16> to vector<8x8xbf16>
    %233 = vector.extract_strided_slice %86 {offsets = [8, 0], sizes = [8, 8], strides = [1, 1]} : vector<16x8xbf16> to vector<8x8xbf16>
    "tpu.trace_start"() <{level = 10 : i32, message = "qd,kd->qk"}> : () -> ()
    %cst_109 = arith.constant dense<0.000000e+00> : vector<8x8xf32>
    %234 = tpu.matmul %231, %232, %cst_109 {dimension_numbers = #tpu.dot_dimension_numbers<[1], [1], [0], [0], [0, 0, 1, 0], [], []>} : vector<8x8xbf16>, vector<8x8xbf16>, vector<8x8xf32> -> vector<8x8xf32>
    "tpu.trace_stop"() : () -> ()
    %cst_110 = arith.constant 0.353553385 : f32
    %235 = vector.broadcast %cst_110 : f32 to vector<8x8xf32>
    %236 = arith.mulf %234, %235 : vector<8x8xf32>
    %237 = arith.addf %236, %8 : vector<8x8xf32>
    %cst_111 = arith.constant dense<0xFF800000> : vector<8xf32>
    %238 = vector.multi_reduction <maximumf>, %237, %cst_111 [1] : vector<8x8xf32> to vector<8xf32>
    %239 = vector.shape_cast %238 : vector<8xf32> to vector<8x1xf32>
    %240 = vector.broadcast %239 : vector<8x1xf32> to vector<8x8xf32>
    %241 = arith.subf %237, %240 : vector<8x8xf32>
    %242 = math.exp %241 : vector<8x8xf32>
    %cst_112 = arith.constant dense<0.000000e+00> : vector<8xf32>
    %243 = vector.multi_reduction <add>, %242, %cst_112 [1] : vector<8x8xf32> to vector<8xf32>
    %244 = vector.shape_cast %243 : vector<8xf32> to vector<8x1xf32>
    %245 = tpu.reciprocal %244 {approx = true} : vector<8x1xf32> -> vector<8x1xf32>
    %246 = vector.broadcast %245 : vector<8x1xf32> to vector<8x8xf32>
    %247 = arith.mulf %242, %246 : vector<8x8xf32>
    %248 = arith.truncf %247 : vector<8x8xf32> to vector<8x8xbf16>
    %cst_113 = arith.constant dense<0.000000e+00> : vector<8x8xf32>
    %249 = tpu.matmul %248, %233, %cst_113 {dimension_numbers = #tpu.dot_dimension_numbers<[1], [0], [0], [1], [0, 0, 1, 1], [], []>} : vector<8x8xbf16>, vector<8x8xbf16>, vector<8x8xf32> -> vector<8x8xf32>
    %250 = vector.extract_strided_slice %102 {offsets = [8, 0], sizes = [8, 8], strides = [1, 1]} : vector<16x8xbf16> to vector<8x8xbf16>
    %251 = vector.extract_strided_slice %106 {offsets = [8, 0], sizes = [8, 8], strides = [1, 1]} : vector<16x8xbf16> to vector<8x8xbf16>
    %252 = vector.extract_strided_slice %110 {offsets = [8, 0], sizes = [8, 8], strides = [1, 1]} : vector<16x8xbf16> to vector<8x8xbf16>
    "tpu.trace_start"() <{level = 10 : i32, message = "qd,kd->qk"}> : () -> ()
    %cst_114 = arith.constant dense<0.000000e+00> : vector<8x8xf32>
    %253 = tpu.matmul %250, %251, %cst_114 {dimension_numbers = #tpu.dot_dimension_numbers<[1], [1], [0], [0], [0, 0, 1, 0], [], []>} : vector<8x8xbf16>, vector<8x8xbf16>, vector<8x8xf32> -> vector<8x8xf32>
    "tpu.trace_stop"() : () -> ()
    %cst_115 = arith.constant 0.353553385 : f32
    %254 = vector.broadcast %cst_115 : f32 to vector<8x8xf32>
    %255 = arith.mulf %253, %254 : vector<8x8xf32>
    %256 = arith.addf %255, %8 : vector<8x8xf32>
    %cst_116 = arith.constant dense<0xFF800000> : vector<8xf32>
    %257 = vector.multi_reduction <maximumf>, %256, %cst_116 [1] : vector<8x8xf32> to vector<8xf32>
    %258 = vector.shape_cast %257 : vector<8xf32> to vector<8x1xf32>
    %259 = vector.broadcast %258 : vector<8x1xf32> to vector<8x8xf32>
    %260 = arith.subf %256, %259 : vector<8x8xf32>
    %261 = math.exp %260 : vector<8x8xf32>
    %cst_117 = arith.constant dense<0.000000e+00> : vector<8xf32>
    %262 = vector.multi_reduction <add>, %261, %cst_117 [1] : vector<8x8xf32> to vector<8xf32>
    %263 = vector.shape_cast %262 : vector<8xf32> to vector<8x1xf32>
    %264 = tpu.reciprocal %263 {approx = true} : vector<8x1xf32> -> vector<8x1xf32>
    %265 = vector.broadcast %264 : vector<8x1xf32> to vector<8x8xf32>
    %266 = arith.mulf %261, %265 : vector<8x8xf32>
    %267 = arith.truncf %266 : vector<8x8xf32> to vector<8x8xbf16>
    %cst_118 = arith.constant dense<0.000000e+00> : vector<8x8xf32>
    %268 = tpu.matmul %267, %252, %cst_118 {dimension_numbers = #tpu.dot_dimension_numbers<[1], [0], [0], [1], [0, 0, 1, 1], [], []>} : vector<8x8xbf16>, vector<8x8xbf16>, vector<8x8xf32> -> vector<8x8xf32>
    %269 = vector.extract_strided_slice %126 {offsets = [8, 0], sizes = [8, 8], strides = [1, 1]} : vector<16x8xbf16> to vector<8x8xbf16>
    %270 = vector.extract_strided_slice %130 {offsets = [8, 0], sizes = [8, 8], strides = [1, 1]} : vector<16x8xbf16> to vector<8x8xbf16>
    %271 = vector.extract_strided_slice %134 {offsets = [8, 0], sizes = [8, 8], strides = [1, 1]} : vector<16x8xbf16> to vector<8x8xbf16>
    "tpu.trace_start"() <{level = 10 : i32, message = "qd,kd->qk"}> : () -> ()
    %cst_119 = arith.constant dense<0.000000e+00> : vector<8x8xf32>
    %272 = tpu.matmul %269, %270, %cst_119 {dimension_numbers = #tpu.dot_dimension_numbers<[1], [1], [0], [0], [0, 0, 1, 0], [], []>} : vector<8x8xbf16>, vector<8x8xbf16>, vector<8x8xf32> -> vector<8x8xf32>
    "tpu.trace_stop"() : () -> ()
    %cst_120 = arith.constant 0.353553385 : f32
    %273 = vector.broadcast %cst_120 : f32 to vector<8x8xf32>
    %274 = arith.mulf %272, %273 : vector<8x8xf32>
    %275 = arith.addf %274, %8 : vector<8x8xf32>
    %cst_121 = arith.constant dense<0xFF800000> : vector<8xf32>
    %276 = vector.multi_reduction <maximumf>, %275, %cst_121 [1] : vector<8x8xf32> to vector<8xf32>
    %277 = vector.shape_cast %276 : vector<8xf32> to vector<8x1xf32>
    %278 = vector.broadcast %277 : vector<8x1xf32> to vector<8x8xf32>
    %279 = arith.subf %275, %278 : vector<8x8xf32>
    %280 = math.exp %279 : vector<8x8xf32>
    %cst_122 = arith.constant dense<0.000000e+00> : vector<8xf32>
    %281 = vector.multi_reduction <add>, %280, %cst_122 [1] : vector<8x8xf32> to vector<8xf32>
    %282 = vector.shape_cast %281 : vector<8xf32> to vector<8x1xf32>
    %283 = tpu.reciprocal %282 {approx = true} : vector<8x1xf32> -> vector<8x1xf32>
    %284 = vector.broadcast %283 : vector<8x1xf32> to vector<8x8xf32>
    %285 = arith.mulf %280, %284 : vector<8x8xf32>
    %286 = arith.truncf %285 : vector<8x8xf32> to vector<8x8xbf16>
    %cst_123 = arith.constant dense<0.000000e+00> : vector<8x8xf32>
    %287 = tpu.matmul %286, %271, %cst_123 {dimension_numbers = #tpu.dot_dimension_numbers<[1], [0], [0], [1], [0, 0, 1, 1], [], []>} : vector<8x8xbf16>, vector<8x8xbf16>, vector<8x8xf32> -> vector<8x8xf32>
    %288 = tpu.concatenate %230, %249, %268, %287 in 1 : vector<8x8xf32>, vector<8x8xf32>, vector<8x8xf32>, vector<8x8xf32> -> vector<8x32xf32>
    %289 = tpu.concatenate %211, %288 in 0 : vector<8x32xf32>, vector<8x32xf32> -> vector<16x32xf32>
    %290 = arith.truncf %289 : vector<16x32xf32> to vector<16x32xbf16>
    %c0_124 = arith.constant 0 : index
    %c0_125 = arith.constant 0 : index
    %c0_126 = arith.constant 0 : index
    %291 = vector.load %arg9[%c0_124, %c0_125, %c0_126] : memref<1x32x32xbf16, #tpu.memory_space<vmem>>, vector<1x32x32xbf16>
    %292 = vector.shape_cast %291 : vector<1x32x32xbf16> to vector<32x32xbf16>
    %cst_127 = arith.constant dense<0.000000e+00> : vector<16x32xf32>
    %293 = tpu.matmul %290, %292, %cst_127 {dimension_numbers = #tpu.dot_dimension_numbers<[1], [0], [0], [1], [0, 0, 1, 1], [], []>} : vector<16x32xbf16>, vector<32x32xbf16>, vector<16x32xf32> -> vector<16x32xf32>
    %c0_128 = arith.constant 0 : index
    %c0_129 = arith.constant 0 : index
    %c0_130 = arith.constant 0 : index
    %294 = vector.load %arg10[%c0_128, %c0_129, %c0_130] : memref<1x1x32xf32, #tpu.memory_space<vmem>>, vector<1x1x32xf32>
    %295 = vector.shape_cast %294 : vector<1x1x32xf32> to vector<1x32xf32>
    %296 = vector.broadcast %295 : vector<1x32xf32> to vector<16x32xf32>
    %297 = arith.addf %293, %296 : vector<16x32xf32>
    %298 = arith.addf %9, %297 : vector<16x32xf32>
    %299 = vector.extract_strided_slice %11 {offsets = [2, 0], sizes = [1, 32], strides = [1, 1]} : vector<4x32xf32> to vector<1x32xf32>
    %300 = vector.extract_strided_slice %11 {offsets = [3, 0], sizes = [1, 32], strides = [1, 1]} : vector<4x32xf32> to vector<1x32xf32>
    %cst_131 = arith.constant dense<0.000000e+00> : vector<16xf32>
    %301 = vector.multi_reduction <add>, %298, %cst_131 [1] : vector<16x32xf32> to vector<16xf32>
    %302 = vector.shape_cast %301 : vector<16xf32> to vector<16x1xf32>
    %cst_132 = arith.constant 3.200000e+01 : f32
    %303 = vector.broadcast %cst_132 : f32 to vector<16x1xf32>
    %304 = arith.divf %302, %303 : vector<16x1xf32>
    %305 = vector.broadcast %304 : vector<16x1xf32> to vector<16x32xf32>
    %306 = arith.subf %298, %305 : vector<16x32xf32>
    %307 = vector.broadcast %304 : vector<16x1xf32> to vector<16x32xf32>
    %308 = arith.subf %298, %307 : vector<16x32xf32>
    %309 = arith.mulf %306, %308 : vector<16x32xf32>
    %cst_133 = arith.constant dense<0.000000e+00> : vector<16xf32>
    %310 = vector.multi_reduction <add>, %309, %cst_133 [1] : vector<16x32xf32> to vector<16xf32>
    %311 = vector.shape_cast %310 : vector<16xf32> to vector<16x1xf32>
    %cst_134 = arith.constant 3.200000e+01 : f32
    %312 = vector.broadcast %cst_134 : f32 to vector<16x1xf32>
    %313 = arith.divf %311, %312 : vector<16x1xf32>
    %314 = vector.broadcast %304 : vector<16x1xf32> to vector<16x32xf32>
    %315 = arith.subf %298, %314 : vector<16x32xf32>
    %cst_135 = arith.constant 9.99999997E-7 : f32
    %316 = vector.broadcast %cst_135 : f32 to vector<16x1xf32>
    %317 = arith.addf %313, %316 : vector<16x1xf32>
    %318 = math.rsqrt %317 : vector<16x1xf32>
    %319 = vector.broadcast %318 : vector<16x1xf32> to vector<16x32xf32>
    %320 = arith.mulf %315, %319 : vector<16x32xf32>
    %321 = vector.broadcast %299 : vector<1x32xf32> to vector<16x32xf32>
    %322 = arith.mulf %320, %321 : vector<16x32xf32>
    %323 = vector.broadcast %300 : vector<1x32xf32> to vector<16x32xf32>
    %324 = arith.addf %322, %323 : vector<16x32xf32>
    %325 = arith.truncf %324 : vector<16x32xf32> to vector<16x32xbf16>
    %c0_136 = arith.constant 0 : index
    %c0_137 = arith.constant 0 : index
    %c0_138 = arith.constant 0 : index
    %326 = vector.load %arg11[%c0_136, %c0_137, %c0_138] : memref<1x32x128xbf16, #tpu.memory_space<vmem>>, vector<1x32x128xbf16>
    %327 = vector.shape_cast %326 : vector<1x32x128xbf16> to vector<32x128xbf16>
    %cst_139 = arith.constant dense<0.000000e+00> : vector<16x128xf32>
    %328 = tpu.matmul %325, %327, %cst_139 {dimension_numbers = #tpu.dot_dimension_numbers<[1], [0], [0], [1], [0, 0, 1, 1], [], []>} : vector<16x32xbf16>, vector<32x128xbf16>, vector<16x128xf32> -> vector<16x128xf32>
    %c0_140 = arith.constant 0 : index
    %c0_141 = arith.constant 0 : index
    %c0_142 = arith.constant 0 : index
    %329 = vector.load %arg12[%c0_140, %c0_141, %c0_142] : memref<1x1x128xf32, #tpu.memory_space<vmem>>, vector<1x1x128xf32>
    %330 = vector.shape_cast %329 : vector<1x1x128xf32> to vector<1x128xf32>
    %331 = vector.broadcast %330 : vector<1x128xf32> to vector<16x128xf32>
    %332 = arith.addf %328, %331 : vector<16x128xf32>
    %cst_143 = arith.constant 5.000000e-01 : f32
    %333 = vector.broadcast %cst_143 : f32 to vector<16x128xf32>
    %334 = arith.mulf %333, %332 : vector<16x128xf32>
    %cst_144 = arith.constant 0.707106769 : f32
    %335 = vector.broadcast %cst_144 : f32 to vector<16x128xf32>
    %336 = arith.mulf %332, %335 : vector<16x128xf32>
    %337 = math.erf %336 : vector<16x128xf32>
    %cst_145 = arith.constant 1.000000e+00 : f32
    %338 = vector.broadcast %cst_145 : f32 to vector<16x128xf32>
    %339 = arith.addf %338, %337 : vector<16x128xf32>
    %340 = arith.mulf %334, %339 : vector<16x128xf32>
    %341 = arith.truncf %340 : vector<16x128xf32> to vector<16x128xbf16>
    %c0_146 = arith.constant 0 : index
    %c0_147 = arith.constant 0 : index
    %c0_148 = arith.constant 0 : index
    %342 = vector.load %arg13[%c0_146, %c0_147, %c0_148] : memref<1x128x32xbf16, #tpu.memory_space<vmem>>, vector<1x128x32xbf16>
    %343 = vector.shape_cast %342 : vector<1x128x32xbf16> to vector<128x32xbf16>
    %cst_149 = arith.constant dense<0.000000e+00> : vector<16x32xf32>
    %344 = tpu.matmul %341, %343, %cst_149 {dimension_numbers = #tpu.dot_dimension_numbers<[1], [0], [0], [1], [0, 0, 1, 1], [], []>} : vector<16x128xbf16>, vector<128x32xbf16>, vector<16x32xf32> -> vector<16x32xf32>
    %c0_150 = arith.constant 0 : index
    %c0_151 = arith.constant 0 : index
    %c0_152 = arith.constant 0 : index
    %345 = vector.load %arg14[%c0_150, %c0_151, %c0_152] : memref<1x1x32xf32, #tpu.memory_space<vmem>>, vector<1x1x32xf32>
    %346 = vector.shape_cast %345 : vector<1x1x32xf32> to vector<1x32xf32>
    %347 = vector.broadcast %346 : vector<1x32xf32> to vector<16x32xf32>
    %348 = arith.addf %344, %347 : vector<16x32xf32>
    %349 = arith.addf %298, %348 : vector<16x32xf32>
    %c0_153 = arith.constant 0 : index
    %c0_154 = arith.constant 0 : index
    %350 = vector.load %arg19[%c0_153, %c0_154] : memref<16x32xf32, #tpu.memory_space<vmem>>, vector<16x32xf32>
    tpu.vector_store %arg19[%c0_153, %c0_154], %349 {strides = array<i32>} : memref<16x32xf32, #tpu.memory_space<vmem>>, vector<16x32xf32>,
    %c1_i32 = arith.constant 1 : i32
    %351 = arith.cmpi eq, %arg0, %c1_i32 : i32
    %352 = arith.extui %351 : i1 to i32
    %c0_i32_155 = arith.constant 0 : i32
    %353 = arith.cmpi ne, %352, %c0_i32_155 : i32
    scf.if %353 {
      %354 = vector.extract_strided_slice %349 {offsets = [0, 0], sizes = [1, 32], strides = [1, 1]} : vector<16x32xf32> to vector<1x32xf32>
      %355 = vector.extract_strided_slice %349 {offsets = [8, 0], sizes = [1, 32], strides = [1, 1]} : vector<16x32xf32> to vector<1x32xf32>
      %356 = tpu.concatenate %354, %355 in 0 : vector<1x32xf32>, vector<1x32xf32> -> vector<2x32xf32>
      %c0_156 = arith.constant 0 : index
      %c0_157 = arith.constant 0 : index
      %357 = vector.load %arg15[%c0_156, %c0_157] : memref<2x32xf32, #tpu.memory_space<vmem>>, vector<1x32xf32>
      %c1 = arith.constant 1 : index
      %c0_158 = arith.constant 0 : index
      %358 = vector.load %arg15[%c1, %c0_158] : memref<2x32xf32, #tpu.memory_space<vmem>>, vector<1x32xf32>
      %cst_159 = arith.constant dense<0.000000e+00> : vector<2xf32>
      %359 = vector.multi_reduction <add>, %356, %cst_159 [1] : vector<2x32xf32> to vector<2xf32>
      %360 = vector.shape_cast %359 : vector<2xf32> to vector<2x1xf32>
      %cst_160 = arith.constant 3.200000e+01 : f32
      %361 = vector.broadcast %cst_160 : f32 to vector<2x1xf32>
      %362 = arith.divf %360, %361 : vector<2x1xf32>
      %363 = vector.broadcast %362 : vector<2x1xf32> to vector<2x32xf32>
      %364 = arith.subf %356, %363 : vector<2x32xf32>
      %365 = vector.broadcast %362 : vector<2x1xf32> to vector<2x32xf32>
      %366 = arith.subf %356, %365 : vector<2x32xf32>
      %367 = arith.mulf %364, %366 : vector<2x32xf32>
      %cst_161 = arith.constant dense<0.000000e+00> : vector<2xf32>
      %368 = vector.multi_reduction <add>, %367, %cst_161 [1] : vector<2x32xf32> to vector<2xf32>
      %369 = vector.shape_cast %368 : vector<2xf32> to vector<2x1xf32>
      %cst_162 = arith.constant 3.200000e+01 : f32
      %370 = vector.broadcast %cst_162 : f32 to vector<2x1xf32>
      %371 = arith.divf %369, %370 : vector<2x1xf32>
      %372 = vector.broadcast %362 : vector<2x1xf32> to vector<2x32xf32>
      %373 = arith.subf %356, %372 : vector<2x32xf32>
      %cst_163 = arith.constant 9.99999997E-7 : f32
      %374 = vector.broadcast %cst_163 : f32 to vector<2x1xf32>
      %375 = arith.addf %371, %374 : vector<2x1xf32>
      %376 = math.rsqrt %375 : vector<2x1xf32>
      %377 = vector.broadcast %376 : vector<2x1xf32> to vector<2x32xf32>
      %378 = arith.mulf %373, %377 : vector<2x32xf32>
      %379 = vector.broadcast %357 : vector<1x32xf32> to vector<2x32xf32>
      %380 = arith.mulf %378, %379 : vector<2x32xf32>
      %381 = vector.broadcast %358 : vector<1x32xf32> to vector<2x32xf32>
      %382 = arith.addf %380, %381 : vector<2x32xf32>
      %c0_164 = arith.constant 0 : index
      %c0_165 = arith.constant 0 : index
      %383 = vector.load %arg16[%c0_164, %c0_165] : memref<32x1xf32, #tpu.memory_space<vmem>>, vector<32x1xf32>
      %cst_166 = arith.constant dense<0.000000e+00> : vector<2x1xf32>
      %384 = tpu.matmul %382, %383, %cst_166 {dimension_numbers = #tpu.dot_dimension_numbers<[1], [0], [0], [1], [0, 0, 1, 1], [], []>} : vector<2x32xf32>, vector<32x1xf32>, vector<2x1xf32> -> vector<2x1xf32>
      %c0_167 = arith.constant 0 : index
      %c0_168 = arith.constant 0 : index
      %385 = vector.load %arg17[%c0_167, %c0_168] : memref<1x1xf32, #tpu.memory_space<vmem>>, vector<1x1xf32>
      %386 = vector.broadcast %385 : vector<1x1xf32> to vector<2x1xf32>
      %387 = arith.addf %384, %386 : vector<2x1xf32>
      %c0_169 = arith.constant 0 : index
      %c0_170 = arith.constant 0 : index
      %388 = vector.load %arg18[%c0_169, %c0_170] : memref<2x1xf32, #tpu.memory_space<vmem>>, vector<2x1xf32>
      tpu.vector_store %arg18[%c0_169, %c0_170], %387 {strides = array<i32>} : memref<2x1xf32, #tpu.memory_space<vmem>>, vector<2x1xf32>,
    } else {
    }
    return
  }
  func.func @transform_0(%arg0: i32) -> (i32, i32) {
    %c0_i32 = arith.constant 0 : i32
    %c0_i32_0 = arith.constant 0 : i32
    %c0_i32_1 = arith.constant 0 : i32
    return %c0_i32, %c0_i32_0 : i32, i32
  }
  func.func @transform_1(%arg0: i32) -> (i32, i32) {
    %c0_i32 = arith.constant 0 : i32
    %c0_i32_0 = arith.constant 0 : i32
    %c0_i32_1 = arith.constant 0 : i32
    return %c0_i32, %c0_i32_0 : i32, i32
  }
  func.func @transform_2(%arg0: i32) -> (i32, i32) {
    %c0_i32 = arith.constant 0 : i32
    %c0_i32_0 = arith.constant 0 : i32
    %c0_i32_1 = arith.constant 0 : i32
    return %c0_i32, %c0_i32_0 : i32, i32
  }
  func.func @transform_3(%arg0: i32) -> (i32, i32) {
    %c0_i32 = arith.constant 0 : i32
    %c0_i32_0 = arith.constant 0 : i32
    %c0_i32_1 = arith.constant 0 : i32
    return %c0_i32, %c0_i32_0 : i32, i32
  }
  func.func @transform_4(%arg0: i32) -> (i32, i32) {
    %c0_i32 = arith.constant 0 : i32
    %c0_i32_0 = arith.constant 0 : i32
    %c0_i32_1 = arith.constant 0 : i32
    return %c0_i32, %c0_i32_0 : i32, i32
  }
  func.func @transform_5(%arg0: i32) -> (i32, i32, i32) {
    %c0_i32 = arith.constant 0 : i32
    %c0_i32_0 = arith.constant 0 : i32
    %c0_i32_1 = arith.constant 0 : i32
    return %arg0, %c0_i32, %c0_i32_0 : i32, i32, i32
  }
  func.func @transform_6(%arg0: i32) -> (i32, i32, i32) {
    %c0_i32 = arith.constant 0 : i32
    %c0_i32_0 = arith.constant 0 : i32
    %c0_i32_1 = arith.constant 0 : i32
    return %arg0, %c0_i32, %c0_i32_0 : i32, i32, i32
  }
  func.func @transform_7(%arg0: i32) -> (i32, i32, i32) {
    %c0_i32 = arith.constant 0 : i32
    %c0_i32_0 = arith.constant 0 : i32
    %c0_i32_1 = arith.constant 0 : i32
    return %arg0, %c0_i32, %c0_i32_0 : i32, i32, i32
  }
  func.func @transform_8(%arg0: i32) -> (i32, i32, i32) {
    %c0_i32 = arith.constant 0 : i32
    %c0_i32_0 = arith.constant 0 : i32
    %c0_i32_1 = arith.constant 0 : i32
    return %arg0, %c0_i32, %c0_i32_0 : i32, i32, i32
  }
  func.func @transform_9(%arg0: i32) -> (i32, i32, i32) {
    %c0_i32 = arith.constant 0 : i32
    %c0_i32_0 = arith.constant 0 : i32
    %c0_i32_1 = arith.constant 0 : i32
    return %arg0, %c0_i32, %c0_i32_0 : i32, i32, i32
  }
  func.func @transform_10(%arg0: i32) -> (i32, i32, i32) {
    %c0_i32 = arith.constant 0 : i32
    %c0_i32_0 = arith.constant 0 : i32
    %c0_i32_1 = arith.constant 0 : i32
    return %arg0, %c0_i32, %c0_i32_0 : i32, i32, i32
  }
  func.func @transform_11(%arg0: i32) -> (i32, i32, i32) {
    %c0_i32 = arith.constant 0 : i32
    %c0_i32_0 = arith.constant 0 : i32
    %c0_i32_1 = arith.constant 0 : i32
    return %arg0, %c0_i32, %c0_i32_0 : i32, i32, i32
  }
  func.func @transform_12(%arg0: i32) -> (i32, i32, i32) {
    %c0_i32 = arith.constant 0 : i32
    %c0_i32_0 = arith.constant 0 : i32
    %c0_i32_1 = arith.constant 0 : i32
    return %arg0, %c0_i32, %c0_i32_0 : i32, i32, i32
  }
  func.func @transform_13(%arg0: i32) -> (i32, i32, i32) {
    %c0_i32 = arith.constant 0 : i32
    %c0_i32_0 = arith.constant 0 : i32
    %c0_i32_1 = arith.constant 0 : i32
    return %arg0, %c0_i32, %c0_i32_0 : i32, i32, i32
  }
  func.func @transform_14(%arg0: i32) -> (i32, i32) {
    %c0_i32 = arith.constant 0 : i32
    %c0_i32_0 = arith.constant 0 : i32
    %c0_i32_1 = arith.constant 0 : i32
    return %c0_i32, %c0_i32_0 : i32, i32
  }
  func.func @transform_15(%arg0: i32) -> (i32, i32) {
    %c0_i32 = arith.constant 0 : i32
    %c0_i32_0 = arith.constant 0 : i32
    %c0_i32_1 = arith.constant 0 : i32
    return %c0_i32, %c0_i32_0 : i32, i32
  }
  func.func @transform_16(%arg0: i32) -> (i32, i32) {
    %c0_i32 = arith.constant 0 : i32
    %c0_i32_0 = arith.constant 0 : i32
    %c0_i32_1 = arith.constant 0 : i32
    return %c0_i32, %c0_i32_0 : i32, i32
  }
  func.func @transform_17(%arg0: i32) -> (i32, i32) {
    %c0_i32 = arith.constant 0 : i32
    %c0_i32_0 = arith.constant 0 : i32
    %c0_i32_1 = arith.constant 0 : i32
    return %c0_i32, %c0_i32_0 : i32, i32
  }
}

</mosaic_0001>

<bundles_post_ra>
// kernel: vit_regressor_forward.1
= control target key start
LH: loop header
LB: loop body
LE: loop exit
PB: predicated region body
PF: predicated region fallthrough
CT: control target
= control target key end

     0   :  { %s3553_s26 = smov 0   ;;  %s4175_s0 = inlined_call_operand.vmem [shape: f32[8,192], index: 0, kind: input, shape index: {}]   ;;  %s4176_s1 = inlined_call_operand.vmem [shape: f32[1,32], index: 1, kind: input, shape index: {}]   ;;  %s4177_s2 = inlined_call_operand.vmem [shape: f32[5,32], index: 2, kind: input, shape index: {}]   ;;  %s4178_s3 = inlined_call_operand.vmem [shape: f32[192,32], index: 3, kind: input, shape index: {}]   ;;  %s4179_s4 = inlined_call_operand.vmem [shape: f32[1,32], index: 4, kind: input, shape index: {}]   ;;  %s4180_s5 = inlined_call_operand.vmem [shape: f32[2,4,32], index: 5, kind: input, shape index: {}]   ;;  %s4181_s6 = inlined_call_operand.vmem [shape: bf16[2,32,96], index: 6, kind: input, shape index: {}]   ;;  %s4182_s7 = inlined_call_operand.vmem [shape: f32[2,1,96], index: 7, kind: input, shape index: {}]   ;;  %s4183_s8 = inlined_call_operand.vmem [shape: bf16[2,32,32], index: 8, kind: input, shape index: {}]   ;;  %s4184_s9 = inlined_call_operand.vmem [shape: f32[2,1,32], index: 9, kind: input, shape index: {}]   ;;  %s4185_s10 = inlined_call_operand.vmem [shape: bf16[2,32,128], index: 10, kind: input, shape index: {}]   ;;  %s4186_s11 = inlined_call_operand.vmem [shape: f32[2,1,128], index: 11, kind: input, shape index: {}]   ;;  %s4187_s12 = inlined_call_operand.vmem [shape: bf16[2,128,32], index: 12, kind: input, shape index: {}]   ;;  %s4188_s13 = inlined_call_operand.vmem [shape: f32[2,1,32], index: 13, kind: input, shape index: {}]   ;;  %s4189_s14 = inlined_call_operand.vmem [shape: f32[2,32], index: 14, kind: input, shape index: {}]   ;;  %s4190_s15 = inlined_call_operand.vmem [shape: f32[32,1], index: 15, kind: input, shape index: {}]   ;;  %s4191_s16 = inlined_call_operand.<no memory space> [shape: f32[1,1], index: 16, kind: input, shape index: {}]   ;;  %s4192_s17 = inlined_call_operand.vmem [shape: f32[2,1], index: 17, kind: output, shape index: {}]  }
   0x1   :  { %4196 = sst [smem:[#allocation5_spill]] %s4175_s0  ;;  %v22_v0 = vstv %s4191_s16 }
   0x2   :  { %4197 = sst [smem:[#allocation6_spill]] %s4176_s1  ;;  %23 = vst [vmem:[#allocation3] sm:$0x1] %v22_v0 }
   0x3   :  { %4198 = sst [smem:[#allocation7_spill]] %s4180_s5 }
   0x4   :  { %4199 = sst [smem:[#allocation8_spill]] %s4181_s6 }
   0x5   :  { %4200 = sst [smem:[#allocation9_spill]] %s4183_s8 }
   0x6   :  { %4201 = sst [smem:[#allocation10_spill]] %s4189_s14 }
   0x7   :  { %4202 = sst [smem:[#allocation11_spill]] %s4192_s17 }
   0x8 LB: > { %4203 = sst [smem:[#allocation4_spill]] %s3438_s26  ;;  %s3559_s27 = sadd.s32 4294967295, %s3438_s26   ;;  %s3438_s26 = sphi %s3553_s26, %s29_s26  }
   0x9   : > { %p2927_p0 = scmp.ge.s32.totalorder %s3438_s26, 1  ;;  %p555_p1 = scmp.lt.s32.totalorder %s3438_s26, 3 }
   0xb   : > { %p556_p2 = pnand %p2927_p0, %p555_p1 }
   0xc   : > { %p633_p3 = scmp.lt.s32.totalorder (!%p556_p2), %s3559_s27, 1  ;;  %s4204_s5 = sld [smem:[#allocation7_spill]] (!%p556_p2) }
   0xd   : > { %559 = sbr.rel (%p556_p2) target bundleno = 3203 (0xc83), region = 88  ;;  %s4205_s6 = sld [smem:[#allocation8_spill]] (!%p556_p2) }
   0xe   : > { %s4206_s8 = sld [smem:[#allocation9_spill]] (!%p556_p2)  ;;  %p2937_p4 = scmp.ne.s32.totalorder (!%p556_p2), %s3559_s27, 0 }
  0x12   : > { %s3565_s16 = scalar_select %p633_p3, %s3559_s27, 1 }
  0x14   : > { %s2928_s28 = sshll.u32 %s3565_s16, 2  ;;  %s2995_s29 = sshll.u32 %s3565_s16, 4 }
  0x15   : > { %s3572_s18 = scalar_lea.vmem %s4204_s5, %s2928_s28  ;;  %s3577_s20 = scalar_lea.vmem %s4205_s6, %s2995_s29 }
  0x16   : > { %s3586_s26 = scalar_lea.vmem %s4206_s8, %s2995_s29  ;;  %s652_s0 = scalar_lea.vmem %s4184_s9, %s3565_s16 }
  0x17   : > { %s3595_s5 = scalar_lea.vmem %s4185_s10, %s2995_s29  ;;  %s660_s6 = scalar_lea.vmem %s4186_s11, %s3565_s16 }
  0x18   : > { %s2998_s21 = sshll.u32 %s3565_s16, 6  ;;  %s668_s14 = scalar_lea.vmem %s4188_s13, %s3565_s16 }
  0x19   : > { %s3605_s24 = scalar_lea.vmem %s4187_s12, %s2998_s21  ;;  %673 = sbr.rel (%p2937_p4) target bundleno = 281 (0x119), region = 92 }
  0x1a   : > { %s4207_s29 = sld [smem:[#allocation5_spill]] (!%p2937_p4) }
  0x1b   : > { %s4208_s21 = sld [smem:[#allocation6_spill]] (!%p2937_p4) }
  0x1e   : > { %v691_v1 = vld [vmem:[%s4178_s3 + $0x78] sm:$0xff]  ;;  %v3440_v2 = vmov 0.0   ;;  %v690_v3 = vld [vmem:[%s4178_s3 + $0x70] sm:$0xff]  ;;  %v689_v4 = vld [vmem:[%s4178_s3 + $0x68] sm:$0xff]  ;;  %vm707_vm0 = vcmask 523264   ;;  %vm796_vm1 = vcmask 1040384  }
  0x1f   : > { %711 = vmatprep.subr.mxu0 %v3440_v2  ;;  %v688_v5 = vld [vmem:[%s4178_s3 + $0x60] sm:$0xff]  ;;  %v687_v6 = vld [vmem:[%s4178_s3 + $0x58] sm:$0xff]  ;;  %v686_v8 = vld [vmem:[%s4178_s3 + $0x50] sm:$0xff]  ;;  %vm798_vm2 = vcmask 1044480   ;;  %vm802_vm3 = vcmask 261120  }
  0x20   : > { %712 = vmatpush1.msra.mxu0 %v691_v1  ;;  %v675_v7 = vld [vmem:[%s4207_s29 + $0x8] sm:$0xff]  ;;  %v684_v10 = vld [vmem:[%s4178_s3 + $0x40] sm:$0xff]  ;;  %v683_v11 = vld [vmem:[%s4178_s3 + $0x38] sm:$0xff] }
  0x21   : > { %713 = vmatprep.subr.mxu0 %v3440_v2  ;;  %2939 = vmatprep.mubr.msk.f32.mxu0 %vm707_vm0, %v675_v7  ;;  %v685_v9 = vld [vmem:[%s4178_s3 + $0x48] sm:$0xff]  ;;  %v682_v12 = vld [vmem:[%s4178_s3 + $0x30] sm:$0xff]  ;;  %v680_v14 = vld [vmem:[%s4178_s3 + $0x20] sm:$0xff] }
  0x22   : > { %714 = vmatpush1.msra.mxu0 %v690_v3  ;;  %v681_v13 = vld [vmem:[%s4178_s3 + $0x28] sm:$0xff]  ;;  %v679_v15 = vld [vmem:[%s4178_s3 + $0x18] sm:$0xff]  ;;  %v678_v16 = vld [vmem:[%s4178_s3 + $0x10] sm:$0xff] }
  0x23   : > { %715 = vmatprep.subr.mxu0 %v3440_v2  ;;  %v677_v17 = vld [vmem:[%s4178_s3 + $0x8] sm:$0xff]  ;;  %v676_v18 = vld [vmem:[%s4178_s3] sm:$0xff]  ;;  %v699_v19 = vld [vmem:[%s4178_s3 + $0xb8] sm:$0xff] }
  0x24   : > { %716 = vmatpush1.msra.mxu0 %v689_v4  ;;  %v698_v20 = vld [vmem:[%s4178_s3 + $0xb0] sm:$0xff]  ;;  %v697_v21 = vld [vmem:[%s4178_s3 + $0xa8] sm:$0xff]  ;;  %v696_v22 = vld [vmem:[%s4178_s3 + $0xa0] sm:$0xff] }
  0x25   : > { %717 = vmatprep.subr.mxu0 %v3440_v2  ;;  %v695_v23 = vld [vmem:[%s4178_s3 + $0x98] sm:$0xff]  ;;  %v694_v24 = vld [vmem:[%s4178_s3 + $0x90] sm:$0xff]  ;;  %v693_v25 = vld [vmem:[%s4178_s3 + $0x88] sm:$0xff] }
  0x26   : > { %718 = vmatpush1.msra.mxu0 %v688_v5  ;;  %v692_v26 = vld [vmem:[%s4178_s3 + $0x80] sm:$0xff] }
  0x27   : > { %719 = vmatprep.subr.mxu0 %v3440_v2  ;;  %v674_v27 = vld [vmem:[%s4207_s29] sm:$0xff] }
  0x28   : > { %720 = vmatpush1.msra.mxu0 %v687_v6  ;;  %v784_v28 = vld [vmem:[%s4177_s2 + $0x1] sm:$0xf]  ;;  %v2938_v29 = vld [vmem:[%s4179_s4] ss:$0 sm:$0xff] }
  0x29   : > { %721 = vmatprep.subr.mxu0 %v3440_v2  ;;  %v787_v30 = vrot.slane %v784_v28, 4  ;;  %v781_v32 = vld [vmem:[%s4208_s21] sm:$0x1] }
  0x2a   : > { %722 = vmatpush1.msra.mxu0 %v686_v8  ;;  %v782_v33 = vld [vmem:[%s4177_s2] sm:$0x1] }
  0x2b   : > { %723 = vmatprep.subr.mxu0 %v3440_v2  ;;  %v783_v36 = vadd.f32 %v782_v33, %v781_v32 }
  0x2c   : > { %724 = vmatpush1.msra.mxu0 %v685_v9 }
  0x2d   : > { %725 = vmatprep.subr.mxu0 %v3440_v2 }
  0x2e   : > { %726 = vmatpush1.msra.mxu0 %v684_v10 }
  0x2f   : > { %727 = vmatprep.subr.mxu0 %v3440_v2 }
  0x30   : > { %728 = vmatpush1.msra.mxu0 %v683_v11 }
  0x31   : > { %729 = vmatprep.subr.mxu0 %v3440_v2 }
  0x32   : > { %730 = vmatpush1.msra.mxu0 %v682_v12 }
  0x33   : > { %731 = vmatprep.subr.mxu0 %v3440_v2 }
  0x34   : > { %732 = vmatpush1.msra.mxu0 %v681_v13 }
  0x35   : > { %733 = vmatprep.subr.mxu0 %v3440_v2 }
  0x36   : > { %734 = vmatpush1.msra.mxu0 %v680_v14 }
  0x37   : > { %735 = vmatprep.subr.mxu0 %v3440_v2 }
  0x38   : > { %736 = vmatpush1.msra.mxu0 %v679_v15 }
  0x39   : > { %737 = vmatprep.subr.mxu0 %v3440_v2 }
  0x3a   : > { %738 = vmatpush1.msra.mxu0 %v678_v16 }
  0x3b   : > { %739 = vmatprep.subr.mxu0 %v3440_v2 }
  0x3c   : > { %740 = vmatpush1.msra.mxu0 %v677_v17 }
  0x3d   : > { %741 = vmatprep.subr.mxu0 %v3440_v2 }
  0x3e   : > { %742 = vmatpush1.msra.mxu0 %v676_v18 }
  0x3f   : > { %759 = vmatprep.subr.mxu0 %v3440_v2 }
  0x40   : > { %760 = vmatpush2.msra.mxu0 %v699_v19 }
  0x41   : > { %761 = vmatprep.subr.mxu0 %v3440_v2 }
  0x42   : > { %762 = vmatpush2.msra.mxu0 %v698_v20 }
  0x43   : > { %763 = vmatprep.subr.mxu0 %v3440_v2 }
  0x44   : > { %764 = vmatpush2.msra.mxu0 %v697_v21 }
  0x45   : > { %765 = vmatprep.subr.mxu0 %v3440_v2 }
  0x46   : > { %766 = vmatpush2.msra.mxu0 %v696_v22 }
  0x47   : > { %767 = vmatprep.subr.mxu0 %v3440_v2 }
  0x48   : > { %768 = vmatpush2.msra.mxu0 %v695_v23 }
  0x49   : > { %769 = vmatprep.subr.mxu0 %v3440_v2 }
  0x4a   : > { %770 = vmatpush2.msra.mxu0 %v694_v24 }
  0x4b   : > { %771 = vmatprep.subr.mxu0 %v3440_v2 }
  0x4c   : > { %772 = vmatpush2.msra.mxu0 %v693_v25 }
  0x4d   : > { %773 = vmatprep.subr.mxu0 %v3440_v2 }
  0x4e   : > { %774 = vmatpush2.msra.mxu0 %v692_v26 }
  0x4f   : > { %776 = vmatmul.mubr.f32.vlgmr.msra.gmra.mxu0 %v674_v27 }
 0x10f   : > { %v777_v31 = vpop.f32.mrf.mxu0 }
 0x110   : > { %v778_v34 = vadd.f32 %v2938_v29, %v777_v31 }
 0x111   : > { %v779_v35 = vpop.f32.mrf.mxu0 }
 0x112   : > { %v785_v37 = vadd.f32 %v784_v28, %v778_v34  ;;  %v789_v38 = vadd.f32 %v787_v30, %v778_v34 }
 0x114   : > { %v791_v39 = vrot.slane %v785_v37, 7  ;;  %v794_v40 = vrot.slane %v789_v38, 3 }
 0x116   : > { %v797_v41 = vsel %vm796_vm1, %v783_v36, %v791_v39  ;;  %v800_v42 = vsel %vm796_vm1, %v783_v36, %v794_v40 }
 0x117   : > { %v799_v43 = vsel %vm798_vm2, %v797_v41, 0.0  ;;  %v801_v44 = vsel %vm798_vm2, %v800_v42, 0.0 }
 0x118   : > { %803 = vst.msk [vmem:[#allocation2] sm:$0xff] %vm802_vm3, %v799_v43  ;;  %804 = vst.msk [vmem:[#allocation2 + $0x8] sm:$0xff] %vm802_vm3, %v801_v44 }
 0x119 PF: > { %vm812_vm4 = vcmask 261120   ;;  %v3729_v49 = vld [vmem:[%s3577_s20 + $0x8] sm:$0xff]   ;;  %s3441_s17 = smov 96   ;;  %s3442_s28 = smov 120   ;;  %v3369_v50 = vld [vmem:[%s3577_s20] sm:$0xff]   ;;  %v3450_v62 = vmov 0.0   ;;  %v805_v5 = vlaneseq }
 0x11a   : > { %s3443_s30 = smov 56   ;;  %s3444_s23 = smov 80   ;;  %3087 = vmatprep.subr.bf16.mxu1 %v3450_v62  ;;  %3119 = vmatprep.subr.bf16.mxu0 %v3450_v62  ;;  %vm3452_vm5 = vmmov 0   ;;  %v811_v13 = vld [vmem:[%s3572_s18] sm:$0xf]  ;;  %vm1482_vm6 = vcmask 64512  }
 0x11b   : > { %s3445_s8 = smov 72   ;;  %s3446_s19 = smov 104   ;;  %3088 = vmatpush3.bf16.msra.mxu1 %v3729_v49  ;;  %3091 = vmatprep.mubr.msk.bf16.mxu1 %vm3452_vm5, %v3450_v62  ;;  %v3796_v9 = vshrl.u32 %v805_v5, 7  ;;  %vm1546_vm8 = vcmask 1043456   ;;  %vm1921_vm9 = vcmask 130048   ;;  %vm1923_vm10 = vcmask 195584  }
 0x11c   : > { %s4209_s21 = scalar_lea.vmem %s4182_s7, %s3565_s16  ;;  %s3447_s22 = smov 112   ;;  %3089 = vmatprep.subr.bf16.mxu1 %v3450_v62  ;;  %3123 = vmatprep.mubr.msk.bf16.mxu0 %vm3452_vm5, %v3450_v62 }
 0x11d   : > { %v3750_v51 = vld [vmem:[%s4209_s21] ss:$0 sm:$0xff]  ;;  %s3448_s25 = smov 40   ;;  %s3451_s20 = smov 88   ;;  %v842_v11 = vsub.s32 0, %v3796_v9  ;;  %v848_v18 = vsub.s32 1, %v3796_v9 }
 0x11e   : > { %p2988_p5 = scmp.ne.s32.totalorder %s3559_s27, 1 }
 0x11f   : > { %v809_v45 = vld [vmem:[#allocation2] sm:$0xff]  ;;  %v810_v46 = vld [vmem:[#allocation2 + $0x8] sm:$0xff]  ;;  %3090 = vmatpush3.bf16.msra.mxu1 %v3369_v50  ;;  %v843_v17 = vrot.slane %v811_v13, %v842_v11  ;;  %v849_v23 = vrot.slane %v811_v13, %v848_v18 }
 0x120   : > { %v813_v47 = vsel %vm812_vm4, %v809_v45, 0.0  ;;  %v816_v48 = vsel %vm812_vm4, %v810_v46, 0.0  ;;  %3095 = vmatprep.subr.bf16.mxu1 %v3450_v62 }
 0x121   : > { %814 = vadd.xlane.f32.xlu0 %v813_v47 }
 0x125   : > { %817 = vadd.xlane.f32.xlu0 %v816_v48 }
 0x13b   : > { %923 = vrot.lane.b32.xlu0 %v3729_v49, %s3441_s17 }
 0x13f   : > { %1025 = vrot.lane.b32.xlu0 %v3729_v49, %s3442_s28 }
 0x143   : > { %1023 = vrot.lane.b32.xlu0 %v3369_v50, %s3442_s28 }
 0x147   : > { %1127 = vrot.lane.b32.xlu0 %v3729_v49, %s3443_s30 }
 0x14b   : > { %1125 = vrot.lane.b32.xlu0 %v3369_v50, %s3443_s30 }
 0x14f   : > { %1229 = vrot.lane.b32.xlu0 %v3729_v49, %s3444_s23 }
 0x153   : > { %1227 = vrot.lane.b32.xlu0 %v3369_v50, %s3444_s23 }
 0x157   : > { %1382 = vrot.lane.b32.xlu0 %v3729_v49, %s3445_s8 }
 0x15b   : > { %1331 = vrot.lane.b32.xlu0 %v3729_v49, %s3446_s19 }
 0x15f   : > { %927 = vrot.lane.b32.xlu0 %v3750_v51, %s3441_s17 }
 0x163   : > { %1029 = vrot.lane.b32.xlu0 %v3750_v51, %s3442_s28  ;;  %s3449_s28 = smov 64  }
 0x167   : > { %1182 = vrot.lane.b32.xlu0 %v3750_v51, %s3447_s22 }
 0x16b   : > { %1335 = vrot.lane.b32.xlu0 %v3750_v51, %s3446_s19 }
 0x16f   : > { %1431 = vrot.lane.b32.xlu0 %v3369_v50, %s3448_s25 }
 0x1aa   : > { %v815_v52 = vpop.xlane.xlu0 %814 }
 0x1ab   : > { %v820_v53 = vmul.f32 0.03125, %v815_v52 }
 0x1ad   : > { %v822_v54 = vsub.f32 %v809_v45, %v820_v53 }
 0x1ae   : > { %v818_v55 = vpop.xlane.xlu0 %817 }
 0x1af   : > { %v821_v56 = vmul.f32 0.03125, %v818_v55  ;;  %v824_v57 = vmul.f32 %v822_v54, %v822_v54 }
 0x1b1   : > { %v3760_v58 = vsub.f32 %v810_v46, %v821_v56  ;;  %v826_v59 = vsel %vm812_vm4, %v824_v57, 0.0 }
 0x1b2   : > { %827 = vadd.xlane.f32.xlu1 %v826_v59  ;;  %v924_v2 = vpop.permute.xlu0 %923 }
 0x1b3   : > { %v825_v60 = vmul.f32 %v3760_v58, %v3760_v58 }
 0x1b5   : > { %v829_v61 = vsel %vm812_vm4, %v825_v60, 0.0 }
 0x1b6   : > { %830 = vadd.xlane.f32.xlu1 %v829_v61  ;;  %v1026_v8 = vpop.permute.xlu0 %1025 }
 0x1ba   : > { %v3799_v12 = vpop.permute.xlu0 %1023 }
 0x1be   : > { %v1128_v20 = vpop.permute.xlu0 %1127 }
 0x1c2   : > { %v1126_v29 = vpop.permute.xlu0 %1125 }
 0x1c6   : > { %v1230_v33 = vpop.permute.xlu0 %1229 }
 0x1c7   : > { %921 = vrot.lane.b32.xlu1 %v3369_v50, %s3441_s17  ;;  %s3453_s17 = smov 48  }
 0x1ca   : > { %v1228_v35 = vpop.permute.xlu0 %1227 }
 0x1cb   : > { %974 = vrot.lane.b32.xlu1 %v3729_v49, %s3449_s28 }
 0x1ce   : > { %v1383_v37 = vpop.permute.xlu0 %1382 }
 0x1cf   : > { %972 = vrot.lane.b32.xlu1 %v3369_v50, %s3449_s28 }
 0x1d2   : > { %v1332_v39 = vpop.permute.xlu0 %1331 }
 0x1d3   : > { %1076 = vrot.lane.b32.xlu1 %v3729_v49, %s3451_s20 }
 0x1d6   : > { %v928_v41 = vpop.permute.xlu0 %927 }
 0x1d7   : > { %1074 = vrot.lane.b32.xlu1 %v3369_v50, %s3451_s20 }
 0x1da   : > { %v3857_v43 = vpop.permute.xlu0 %1029 }
 0x1db   : > { %1178 = vrot.lane.b32.xlu1 %v3729_v49, %s3447_s22 }
 0x1de   : > { %v3865_v45 = vpop.permute.xlu0 %1182 }
 0x1df   : > { %1176 = vrot.lane.b32.xlu1 %v3369_v50, %s3447_s22 }
 0x1e2   : > { %v3874_v47 = vpop.permute.xlu0 %1335 }
 0x1e3   : > { %1280 = vrot.lane.b32.xlu1 %v3729_v49, %s3453_s17 }
 0x1e7   : > { %1278 = vrot.lane.b32.xlu1 %v3369_v50, %s3453_s17 }
 0x1eb   : > { %1380 = vrot.lane.b32.xlu1 %v3369_v50, %s3445_s8 }
 0x1ef   : > { %1329 = vrot.lane.b32.xlu1 %v3369_v50, %s3446_s19  ;;  %s4211_s19 = sld [smem:[#allocation11_spill]] (!%p2988_p5) }
 0x1f3   : > { %1080 = vrot.lane.b32.xlu1 %v3750_v51, %s3451_s20 }
 0x1f7   : > { %1233 = vrot.lane.b32.xlu1 %v3750_v51, %s3444_s23  ;;  %s3456_s23 = smov 16  }
 0x1fb   : > { %1386 = vrot.lane.b32.xlu1 %v3750_v51, %s3445_s8  ;;  %s3457_s8 = smov 24  }
 0x1ff   : > { %1433 = vrot.lane.b32.xlu1 %v3729_v49, %s3448_s25  ;;  %v1432_v49 = vpop.permute.xlu0 %1431 }
 0x23b   : > { %v828_v63 = vpop.xlane.xlu1 %827 }
 0x23c   : > { %v832_v0 = vmul.f32 0.03125, %v828_v63 }
 0x23e   : > { %v834_v1 = vadd.f32 1e-06, %v832_v0 }
 0x23f   : > { %v831_v3 = vpop.xlane.xlu1 %830 }
 0x240   : > { %3383 = vrsqrt.f32 %v834_v1  ;;  %v833_v4 = vmul.f32 0.03125, %v831_v3 }
 0x242   : > { %v835_v6 = vadd.f32 1e-06, %v833_v4 }
 0x243   : > { %v922_v7 = vpop.permute.xlu1 %921 }
 0x244   : > { %3385 = vrsqrt.f32 %v835_v6 }
 0x247   : > { %v975_v10 = vpop.permute.xlu1 %974 }
 0x24b   : > { %v973_v14 = vpop.permute.xlu1 %972 }
 0x24d   : > { %v3384_v15 = vpop.eup %3383 }
 0x24e   : > { %v838_v16 = vmul.f32 %v3384_v15, %v822_v54 }
 0x24f   : > { %v1077_v19 = vpop.permute.xlu1 %1076 }
 0x250   : > { %3120 = vmatpush3.bf16.msra.mxu0 %v1077_v19  ;;  %v844_v22 = vmul.f32 %v843_v17, %v838_v16 }
 0x251   : > { %v3386_v21 = vpop.eup %3385  ;;  %3121 = vmatprep.subr.bf16.mxu0 %v3450_v62 }
 0x252   : > { %v839_v24 = vmul.f32 %v3386_v21, %v3760_v58  ;;  %v850_v27 = vadd.f32 %v849_v23, %v844_v22 }
 0x253   : > { %v1075_v25 = vpop.permute.xlu1 %1074 }
 0x254   : > { %v845_v26 = vmul.f32 %v843_v17, %v839_v24  ;;  %3122 = vmatpush3.bf16.msra.mxu0 %v1075_v25 }
 0x255   : > { %3135 = vmatprep.subr.bf16.mxu0 %v3450_v62 }
 0x256   : > { %v851_v28 = vadd.f32 %v849_v23, %v845_v26 }
 0x257   : > { %v1179_v30 = vpop.permute.xlu1 %1178 }
 0x258   : > { %v3806_v31 = vpack.c.bf16 %v851_v28, %v850_v27 }
 0x25a   : > { %3092 = vmatmul.mubr.msk.bf16.vlgmr.msra.gmra.mxu1 %vm812_vm4, %v3806_v31  ;;  %3124 = vmatmul.mubr.msk.bf16.vlgmr.msra.gmra.mxu0 %vm812_vm4, %v3806_v31 }
 0x25b   : > { %3096 = vmatpush3.bf16.msra.mxu1 %v924_v2  ;;  %3136 = vmatpush3.bf16.msra.mxu0 %v1179_v30  ;;  %v1177_v32 = vpop.permute.xlu1 %1176 }
 0x25c   : > { %3097 = vmatprep.subr.bf16.mxu1 %v3450_v62  ;;  %3137 = vmatprep.subr.bf16.mxu0 %v3450_v62 }
 0x25d   : > { %3099 = vmatprep.mubr.msk.bf16.mxu1 %vm3452_vm5, %v3450_v62  ;;  %3139 = vmatprep.mubr.msk.bf16.mxu0 %vm3452_vm5, %v3450_v62 }
 0x25f   : > { %3098 = vmatpush3.bf16.msra.mxu1 %v922_v7  ;;  %3138 = vmatpush3.bf16.msra.mxu0 %v1177_v32  ;;  %v1281_v34 = vpop.permute.xlu1 %1280 }
 0x260   : > { %3103 = vmatprep.subr.bf16.mxu1 %v3450_v62  ;;  %3151 = vmatprep.subr.bf16.mxu0 %v3450_v62 }
 0x262   : > { %3100 = vmatmul.mubr.msk.bf16.vlgmr.msra.gmra.mxu1 %vm812_vm4, %v3806_v31  ;;  %3140 = vmatmul.mubr.msk.bf16.vlgmr.msra.gmra.mxu0 %vm812_vm4, %v3806_v31 }
 0x263   : > { %3104 = vmatpush3.bf16.msra.mxu1 %v975_v10  ;;  %3152 = vmatpush3.bf16.msra.mxu0 %v1281_v34  ;;  %v1279_v36 = vpop.permute.xlu1 %1278 }
 0x264   : > { %3105 = vmatprep.subr.bf16.mxu1 %v3450_v62  ;;  %3153 = vmatprep.subr.bf16.mxu0 %v3450_v62 }
 0x265   : > { %3107 = vmatprep.mubr.msk.bf16.mxu1 %vm3452_vm5, %v3450_v62  ;;  %3155 = vmatprep.mubr.msk.bf16.mxu0 %vm3452_vm5, %v3450_v62 }
 0x267   : > { %3106 = vmatpush3.bf16.msra.mxu1 %v973_v14  ;;  %3154 = vmatpush3.bf16.msra.mxu0 %v1279_v36  ;;  %v1381_v38 = vpop.permute.xlu1 %1380 }
 0x268   : > { %3111 = vmatprep.subr.bf16.mxu1 %v3450_v62  ;;  %3167 = vmatprep.subr.bf16.mxu0 %v3450_v62 }
 0x26a   : > { %3108 = vmatmul.mubr.msk.bf16.vlgmr.msra.gmra.mxu1 %vm812_vm4, %v3806_v31  ;;  %3156 = vmatmul.mubr.msk.bf16.vlgmr.msra.gmra.mxu0 %vm812_vm4, %v3806_v31 }
 0x26b   : > { %3112 = vmatpush3.bf16.msra.mxu1 %v1026_v8  ;;  %3168 = vmatpush3.bf16.msra.mxu0 %v1383_v37  ;;  %v1330_v40 = vpop.permute.xlu1 %1329 }
 0x26c   : > { %3113 = vmatprep.subr.bf16.mxu1 %v3450_v62  ;;  %3169 = vmatprep.subr.bf16.mxu0 %v3450_v62 }
 0x26d   : > { %3115 = vmatprep.mubr.msk.bf16.mxu1 %vm3452_vm5, %v3450_v62  ;;  %3171 = vmatprep.mubr.msk.bf16.mxu0 %vm3452_vm5, %v3450_v62 }
 0x26f   : > { %3114 = vmatpush3.bf16.msra.mxu1 %v3799_v12  ;;  %3170 = vmatpush3.bf16.msra.mxu0 %v1381_v38  ;;  %v1081_v42 = vpop.permute.xlu1 %1080 }
 0x270   : > { %3127 = vmatprep.subr.bf16.mxu1 %v3450_v62  ;;  %3183 = vmatprep.subr.bf16.mxu0 %v3450_v62 }
 0x272   : > { %3116 = vmatmul.mubr.msk.bf16.vlgmr.msra.gmra.mxu1 %vm812_vm4, %v3806_v31  ;;  %3172 = vmatmul.mubr.msk.bf16.vlgmr.msra.gmra.mxu0 %vm812_vm4, %v3806_v31 }
 0x273   : > { %3128 = vmatpush3.bf16.msra.mxu1 %v1128_v20  ;;  %3131 = vmatprep.mubr.msk.bf16.mxu1 %vm3452_vm5, %v3450_v62  ;;  %v3862_v44 = vpop.permute.xlu1 %1233 }
 0x274   : > { %3129 = vmatprep.subr.bf16.mxu1 %v3450_v62  ;;  %3185 = vmatprep.mubr.msk.bf16.mxu0 %vm3452_vm5, %v3450_v62 }
 0x277   : > { %3130 = vmatpush3.bf16.msra.mxu1 %v1126_v29  ;;  %v3869_v46 = vpop.permute.xlu1 %1386 }
 0x278   : > { %3143 = vmatprep.subr.bf16.mxu1 %v3450_v62 }
 0x27a   : > { %3132 = vmatmul.mubr.msk.bf16.vlgmr.msra.gmra.mxu1 %vm812_vm4, %v3806_v31 }
 0x27b   : > { %3144 = vmatpush3.bf16.msra.mxu1 %v1230_v33  ;;  %3147 = vmatprep.mubr.msk.bf16.mxu1 %vm3452_vm5, %v3450_v62  ;;  %v1434_v48 = vpop.permute.xlu1 %1433 }
 0x27c   : > { %3145 = vmatprep.subr.bf16.mxu1 %v3450_v62 }
 0x27f   : > { %3146 = vmatpush3.bf16.msra.mxu1 %v1228_v35 }
 0x280   : > { %3159 = vmatprep.subr.bf16.mxu1 %v3450_v62 }
 0x282   : > { %3148 = vmatmul.mubr.msk.bf16.vlgmr.msra.gmra.mxu1 %vm812_vm4, %v3806_v31 }
 0x283   : > { %3160 = vmatpush3.bf16.msra.mxu1 %v1332_v39  ;;  %3163 = vmatprep.mubr.msk.bf16.mxu1 %vm3452_vm5, %v3450_v62 }
 0x284   : > { %3161 = vmatprep.subr.bf16.mxu1 %v3450_v62 }
 0x287   : > { %3162 = vmatpush3.bf16.msra.mxu1 %v1330_v40 }
 0x288   : > { %3175 = vmatprep.subr.bf16.mxu1 %v3450_v62 }
 0x28a   : > { %3164 = vmatmul.mubr.msk.bf16.vlgmr.msra.gmra.mxu1 %vm812_vm4, %v3806_v31 }
 0x28b   : > { %3176 = vmatpush3.bf16.msra.mxu1 %v1434_v48  ;;  %3179 = vmatprep.mubr.msk.bf16.mxu1 %vm3452_vm5, %v3450_v62 }
 0x28c   : > { %3177 = vmatprep.subr.bf16.mxu1 %v3450_v62 }
 0x28f   : > { %3178 = vmatpush3.bf16.msra.mxu1 %v1432_v49 }
 0x290   : > { %3189 = vmatprep.subr.bf16.mxu1 %v3450_v62 }
 0x292   : > { %3180 = vmatmul.mubr.msk.bf16.vlgmr.msra.gmra.mxu1 %vm812_vm4, %v3806_v31 }
 0x293   : > { %3191 = vmatprep.mubr.msk.bf16.mxu1 %vm3452_vm5, %v3450_v62 }
 0x31a   : > { %v913_v50 = vpop.f32.mrf.mxu1  ;;  %v1117_v52 = vpop.f32.mrf.mxu0 }
 0x31b   : > { %v1118_v15 = vadd.f32 %v1117_v52, %v1081_v42  ;;  %v914_v19 = vadd.f32 %v3750_v51, %v913_v50 }
 0x31c   : > { %v3093_v53 = vpop.f32.mrf.mxu1  ;;  %v3125_v54 = vpop.f32.mrf.mxu0 }
 0x31e   : > { %v916_v55 = vpop.f32.mrf.mxu1  ;;  %v1120_v56 = vpop.f32.mrf.mxu0 }
 0x31f   : > { %v1121_v11 = vadd.f32 %v1120_v56, %v1081_v42  ;;  %v917_v16 = vadd.f32 %v3750_v51, %v916_v55 }
 0x320   : > { %v3094_v57 = vpop.f32.mrf.mxu1  ;;  %v3126_v58 = vpop.f32.mrf.mxu0 }
 0x321   : > { %v3904_v20 = vpack.c.bf16 %v1121_v11, %v1118_v15  ;;  %v3906_v23 = vpack.c.bf16 %v917_v16, %v914_v19 }
 0x322   : > { %v964_v59 = vpop.f32.mrf.mxu1  ;;  %v3887_v60 = vpop.f32.mrf.mxu0 }
 0x323   : > { %v965_v2 = vadd.f32 %v964_v59, %v928_v41  ;;  %v1594_v26 = vsel %vm1482_vm6, %v3904_v20, 0  ;;  %v1220_v59 = vadd.f32 %v3887_v60, %v3865_v45 }
 0x324   : > { %v3101_v61 = vpop.f32.mrf.mxu1  ;;  %v3141_v63 = vpop.f32.mrf.mxu0 }
 0x326   : > { %v967_v0 = vpop.f32.mrf.mxu1  ;;  %v1222_v1 = vpop.f32.mrf.mxu0 }
 0x327   : > { %v968_v3 = vadd.f32 %v967_v0, %v928_v41  ;;  %v1223_v56 = vadd.f32 %v1222_v1, %v3865_v45 }
 0x328   : > { %v3102_v4 = vpop.f32.mrf.mxu1  ;;  %v3142_v6 = vpop.f32.mrf.mxu0 }
 0x329   : > { %v3889_v7 = vpack.c.bf16 %v968_v3, %v965_v2  ;;  %v1226_v63 = vpack.c.bf16 %v1223_v56, %v1220_v59 }
 0x32a   : > { %v3891_v8 = vpop.f32.mrf.mxu1  ;;  %v3893_v10 = vpop.f32.mrf.mxu0 }
 0x32b   : > { %v1487_v12 = vsel %vm1482_vm6, %v3889_v7, 0  ;;  %v1928_v45 = vrot.slane %v3889_v7, 4  ;;  %v2150_v19 = vrot.slane %v1226_v63, 4 }
 0x32c   : > { %v3109_v13 = vpop.f32.mrf.mxu1  ;;  %v3157_v14 = vpop.f32.mrf.mxu0  ;;  %3184 = vmatpush3.bf16.xpose.msra.mxu0 %v1487_v12  ;;  %v2040_v12 = vrot.slane %v3904_v20, 4 }
 0x32d   : > { %3195 = vmatprep.subr.bf16.mxu0 %v3450_v62  ;;  %v1933_v11 = vsel %vm1482_vm6, %v1928_v45, 0  ;;  %v1926_v13 = vrot.slane %v3906_v23, 4 }
 0x32e   : > { %v3899_v17 = vpop.f32.mrf.mxu1  ;;  %v3901_v18 = vpop.f32.mrf.mxu0 }
 0x330   : > { %v3110_v21 = vpop.f32.mrf.mxu1  ;;  %v3158_v22 = vpop.f32.mrf.mxu0 }
 0x331   : > { %v806_v22 = vand.u32 127, %v805_v5 }
 0x332   : > { %v1066_v24 = vpop.f32.mrf.mxu1  ;;  %v1423_v25 = vpop.f32.mrf.mxu0 }
 0x333   : > { %3186 = vmatmul.mubr.msk.bf16.vlgmr.msra.gmra.mxu0 %vm1482_vm6, %v3906_v23  ;;  %v1067_v31 = vadd.f32 %v1066_v24, %v3857_v43  ;;  %v1424_v57 = vadd.f32 %v1423_v25, %v3869_v46  ;;  %vm807_vm7 = vcmp.lt.s32.totalorder %v806_v22, 5  ;;  %v3454_v24 = vmov -1e+30  }
 0x334   : > { %v3117_v27 = vpop.f32.mrf.mxu1  ;;  %v3173_v28 = vpop.f32.mrf.mxu0  ;;  %3196 = vmatpush3.bf16.xpose.msra.mxu0 %v1594_v26  ;;  %3197 = vmatprep.mubr.msk.bf16.mxu0 %vm3452_vm5, %v3450_v62  ;;  %v808_v25 = vsel %vm807_vm7, 0.0, %v3454_v24 }
 0x335   : > { %3207 = vmatprep.subr.bf16.mxu0 %v3450_v62 }
 0x336   : > { %v1069_v29 = vpop.f32.mrf.mxu1  ;;  %v1426_v30 = vpop.f32.mrf.mxu0 }
 0x337   : > { %v1070_v32 = vadd.f32 %v1069_v29, %v3857_v43  ;;  %v1427_v53 = vadd.f32 %v1426_v30, %v3869_v46 }
 0x338   : > { %v3118_v33 = vpop.f32.mrf.mxu1  ;;  %v3174_v34 = vpop.f32.mrf.mxu0 }
 0x339   : > { %v1073_v35 = vpack.c.bf16 %v1070_v32, %v1067_v31 }
 0x33a   : > { %v3917_v36 = vpop.f32.mrf.mxu1 }
 0x33b   : > { %3198 = vmatmul.mubr.msk.bf16.vlgmr.msra.gmra.mxu0 %vm1482_vm6, %v1073_v35  ;;  %v2038_v14 = vrot.slane %v1073_v35, 4 }
 0x33c   : > { %v3133_v37 = vpop.f32.mrf.mxu1  ;;  %3209 = vmatprep.mubr.msk.bf16.mxu0 %vm3452_vm5, %v3450_v62 }
 0x33e   : > { %v3922_v38 = vpop.f32.mrf.mxu1 }
 0x340   : > { %v3134_v39 = vpop.f32.mrf.mxu1 }
 0x342   : > { %v1270_v40 = vpop.f32.mrf.mxu1 }
 0x343   : > { %v1271_v48 = vadd.f32 %v1270_v40, %v3862_v44 }
 0x344   : > { %v3149_v41 = vpop.f32.mrf.mxu1 }
 0x346   : > { %v1273_v42 = vpop.f32.mrf.mxu1 }
 0x347   : > { %v1274_v43 = vadd.f32 %v1273_v42, %v3862_v44  ;;  %v1430_v44 = vpack.c.bf16 %v1427_v53, %v1424_v57 }
 0x348   : > { %v3150_v49 = vpop.f32.mrf.mxu1 }
 0x349   : > { %v1277_v50 = vpack.c.bf16 %v1274_v43, %v1271_v48  ;;  %v1806_v2 = vsel %vm1482_vm6, %v1430_v44, 0  ;;  %v2264_v16 = vrot.slane %v1430_v44, 4 }
 0x34a   : > { %v1372_v52 = vpop.f32.mrf.mxu1 }
 0x34b   : > { %v1700_v54 = vsel %vm1482_vm6, %v1277_v50, 0  ;;  %v1373_v60 = vadd.f32 %v1372_v52, %v3874_v47  ;;  %v2152_v7 = vrot.slane %v1277_v50, 4  ;;  %v2269_v20 = vsel %vm1482_vm6, %v2264_v16, 0 }
 0x34c   : > { %v3165_v55 = vpop.f32.mrf.mxu1  ;;  %3208 = vmatpush3.bf16.xpose.msra.mxu0 %v1700_v54 }
 0x34d   : > { %3219 = vmatprep.subr.bf16.mxu0 %v3450_v62  ;;  %v2157_v15 = vsel %vm1482_vm6, %v2152_v7, 0 }
 0x34e   : > { %v1375_v58 = vpop.f32.mrf.mxu1 }
 0x34f   : > { %v1376_v46 = vadd.f32 %v1375_v58, %v3874_v47  ;;  %v2045_v47 = vsel %vm1482_vm6, %v2040_v12, 0 }
 0x350   : > { %v3166_v61 = vpop.f32.mrf.mxu1 }
 0x351   : > { %v1379_v6 = vpack.c.bf16 %v1376_v46, %v1373_v60 }
 0x352   : > { %v3933_v0 = vpop.f32.mrf.mxu1 }
 0x353   : > { %3210 = vmatmul.mubr.msk.bf16.vlgmr.msra.gmra.mxu0 %vm1482_vm6, %v1226_v63  ;;  %v2262_v21 = vrot.slane %v1379_v6, 4 }
 0x354   : > { %v3181_v3 = vpop.f32.mrf.mxu1  ;;  %3220 = vmatpush3.bf16.xpose.msra.mxu0 %v1806_v2  ;;  %3221 = vmatprep.mubr.msk.bf16.mxu0 %vm3452_vm5, %v3450_v62 }
 0x355   : > { %3231 = vmatprep.subr.bf16.mxu0 %v3450_v62 }
 0x356   : > { %v3941_v1 = vpop.f32.mrf.mxu1 }
 0x358   : > { %v3182_v4 = vpop.f32.mrf.mxu1 }
 0x35b   : > { %3222 = vmatmul.mubr.msk.bf16.vlgmr.msra.gmra.mxu0 %vm1482_vm6, %v1379_v6 }
 0x35c   : > { %3232 = vmatpush3.bf16.xpose.msra.mxu0 %v1933_v11  ;;  %3233 = vmatprep.mubr.msk.bf16.mxu0 %vm3452_vm5, %v3450_v62 }
 0x35d   : > { %3243 = vmatprep.subr.bf16.mxu0 %v3450_v62 }
 0x363   : > { %3234 = vmatmul.mubr.msk.bf16.vlgmr.msra.gmra.mxu0 %vm1482_vm6, %v1926_v13 }
 0x364   : > { %3244 = vmatpush3.bf16.xpose.msra.mxu0 %v2045_v47  ;;  %3245 = vmatprep.mubr.msk.bf16.mxu0 %vm3452_vm5, %v3450_v62 }
 0x365   : > { %3255 = vmatprep.subr.bf16.mxu0 %v3450_v62 }
 0x36b   : > { %3246 = vmatmul.mubr.msk.bf16.vlgmr.msra.gmra.mxu0 %vm1482_vm6, %v2038_v14 }
 0x36c   : > { %3256 = vmatpush3.bf16.xpose.msra.mxu0 %v2157_v15  ;;  %3257 = vmatprep.mubr.msk.bf16.mxu0 %vm3452_vm5, %v3450_v62 }
 0x36d   : > { %3267 = vmatprep.subr.bf16.mxu0 %v3450_v62 }
 0x373   : > { %3258 = vmatmul.mubr.msk.bf16.vlgmr.msra.gmra.mxu0 %vm1482_vm6, %v2150_v19 }
 0x374   : > { %3268 = vmatpush3.bf16.xpose.msra.mxu0 %v2269_v20  ;;  %3269 = vmatprep.mubr.msk.bf16.mxu0 %vm3452_vm5, %v3450_v62 }
 0x375   : > { %3279 = vmatprep.subr.bf16.mxu0 %v3450_v62 }
 0x37b   : > { %3270 = vmatmul.mubr.msk.bf16.vlgmr.msra.gmra.mxu0 %vm1482_vm6, %v2262_v21 }
 0x37c   : > { %3283 = vmatprep.mubr.msk.bf16.mxu0 %vm3452_vm5, %v3450_v62 }
 0x3f3   : > { %v1523_v23 = vpop.f32.mrf.mxu0 }
 0x3f4   : > { %v1529_v26 = vmul.f32 0.35355338, %v1523_v23 }
 0x3f5   : > { %v3187_v27 = vpop.f32.mrf.mxu0 }
 0x3f6   : > { %v3971_v28 = vadd.f32 %v1529_v26, %v808_v25 }
 0x3f7   : > { %v1526_v29 = vpop.f32.mrf.mxu0 }
 0x3f8   : > { %v1531_v30 = vsel %vm1482_vm6, %v3971_v28, -inf }
 0x3f9   : > { %v3188_v31 = vpop.f32.mrf.mxu0  ;;  %1532 = vmax.xlane.f32.xlu1 %v1531_v30 }
 0x3fb   : > { %v1630_v32 = vpop.f32.mrf.mxu0 }
 0x3fc   : > { %v1636_v33 = vmul.f32 0.35355338, %v1630_v32 }
 0x3fd   : > { %v3199_v34 = vpop.f32.mrf.mxu0 }
 0x3fe   : > { %v1637_v35 = vadd.f32 %v1636_v33, %v808_v25 }
 0x3ff   : > { %v1633_v37 = vpop.f32.mrf.mxu0 }
 0x400   : > { %v1638_v5 = vsel %vm1482_vm6, %v1637_v35, -inf }
 0x401   : > { %v3200_v39 = vpop.f32.mrf.mxu0  ;;  %1639 = vmax.xlane.f32.xlu0 %v1638_v5 }
 0x413   : > { %v1736_v40 = vpop.f32.mrf.mxu0 }
 0x414   : > { %v1742_v41 = vmul.f32 0.35355338, %v1736_v40 }
 0x415   : > { %v3211_v42 = vpop.f32.mrf.mxu0 }
 0x416   : > { %v1743_v48 = vadd.f32 %v1742_v41, %v808_v25 }
 0x417   : > { %v1739_v43 = vpop.f32.mrf.mxu0 }
 0x418   : > { %v1744_v49 = vsel %vm1482_vm6, %v1743_v48, -inf }
 0x419   : > { %v3212_v50 = vpop.f32.mrf.mxu0  ;;  %1745 = vmax.xlane.f32.xlu0 %v1744_v49 }
 0x41b   : > { %v1842_v52 = vpop.f32.mrf.mxu0 }
 0x41c   : > { %v1848_v53 = vmul.f32 0.35355338, %v1842_v52 }
 0x41d   : > { %v3223_v54 = vpop.f32.mrf.mxu0 }
 0x41e   : > { %v1849_v55 = vadd.f32 %v1848_v53, %v808_v25 }
 0x41f   : > { %v1845_v56 = vpop.f32.mrf.mxu0 }
 0x420   : > { %v1850_v57 = vsel %vm1482_vm6, %v1849_v55, -inf }
 0x421   : > { %v3224_v58 = vpop.f32.mrf.mxu0  ;;  %1851 = vmax.xlane.f32.xlu0 %v1850_v57 }
 0x423   : > { %v1969_v59 = vpop.f32.mrf.mxu0 }
 0x424   : > { %v1975_v44 = vmul.f32 0.35355338, %v1969_v59 }
 0x425   : > { %v3235_v61 = vpop.f32.mrf.mxu0 }
 0x426   : > { %v3978_v63 = vadd.f32 %v1975_v44, %v808_v25 }
 0x427   : > { %v1972_v2 = vpop.f32.mrf.mxu0 }
 0x428   : > { %v1977_v3 = vsel %vm1482_vm6, %v3978_v63, -inf }
 0x429   : > { %v3236_v46 = vpop.f32.mrf.mxu0  ;;  %1978 = vmax.xlane.f32.xlu1 %v1977_v3 }
 0x42b   : > { %v2081_v45 = vpop.f32.mrf.mxu0 }
 0x42c   : > { %v2087_v60 = vmul.f32 0.35355338, %v2081_v45 }
 0x42d   : > { %v3247_v4 = vpop.f32.mrf.mxu0 }
 0x42e   : > { %v2088_v6 = vadd.f32 %v2087_v60, %v808_v25 }
 0x42f   : > { %v2084_v11 = vpop.f32.mrf.mxu0 }
 0x430   : > { %v2089_v12 = vsel %vm1482_vm6, %v2088_v6, -inf }
 0x431   : > { %v3248_v13 = vpop.f32.mrf.mxu0  ;;  %2090 = vmax.xlane.f32.xlu0 %v2089_v12 }
 0x433   : > { %v2193_v47 = vpop.f32.mrf.mxu0 }
 0x434   : > { %v2199_v7 = vmul.f32 0.35355338, %v2193_v47 }
 0x435   : > { %v3259_v14 = vpop.f32.mrf.mxu0 }
 0x436   : > { %v3983_v15 = vadd.f32 %v2199_v7, %v808_v25 }
 0x437   : > { %v2196_v16 = vpop.f32.mrf.mxu0 }
 0x438   : > { %v2201_v19 = vsel %vm1482_vm6, %v3983_v15, -inf }
 0x439   : > { %v3260_v20 = vpop.f32.mrf.mxu0  ;;  %2202 = vmax.xlane.f32.xlu1 %v2201_v19 }
 0x43b   : > { %v2305_v21 = vpop.f32.mrf.mxu0 }
 0x43c   : > { %v2311_v26 = vmul.f32 0.35355338, %v2305_v21 }
 0x43d   : > { %v3271_v22 = vpop.f32.mrf.mxu0 }
 0x43e   : > { %v2312_v27 = vadd.f32 %v2311_v26, %v808_v25 }
 0x43f   : > { %v2308_v23 = vpop.f32.mrf.mxu0 }
 0x440   : > { %v2313_v29 = vsel %vm1482_vm6, %v2312_v27, -inf }
 0x441   : > { %v3272_v24 = vpop.f32.mrf.mxu0 }
 0x447   : > { %978 = vrot.lane.b32.xlu0 %v3750_v51, %s3449_s28 }
 0x466   : > { %2314 = vmax.xlane.f32.xlu0 %v2313_v29 }
 0x482   : > { %v1533_v30 = vpop.xlane.xlu1 %1532 }
 0x483   : > { %v1534_v31 = vsub.f32 %v3971_v28, %v1533_v30 }
 0x485   : > { %v1535_v32 = vmul.f32 1.442695, %v1534_v31 }
 0x487   : > { %3387 = vpow2.f32 %v1535_v32 }
 0x48a   : > { %v1640_v33 = vpop.xlane.xlu0 %1639 }
 0x48b   : > { %v1641_v34 = vsub.f32 %v1637_v35, %v1640_v33 }
 0x48d   : > { %v1642_v37 = vmul.f32 1.442695, %v1641_v34 }
 0x48f   : > { %3389 = vpow2.f32 %v1642_v37 }
 0x494   : > { %v3388_v5 = vpop.eup %3387 }
 0x495   : > { %v1537_v39 = vsel %vm1482_vm6, %v3388_v5, 0.0 }
 0x496   : > { %1538 = vadd.xlane.f32.xlu1 %v1537_v39 }
 0x49c   : > { %v3992_v40 = vpop.eup %3389 }
 0x49d   : > { %v1644_v25 = vsel %vm1482_vm6, %v3992_v40, 0.0 }
 0x49e   : > { %1645 = vadd.xlane.f32.xlu0 %v1644_v25 }
 0x4a2   : > { %v1746_v41 = vpop.xlane.xlu0 %1745 }
 0x4a3   : > { %v1747_v42 = vsub.f32 %v1743_v48, %v1746_v41 }
 0x4a5   : > { %v1748_v43 = vmul.f32 1.442695, %v1747_v42 }
 0x4a7   : > { %3391 = vpow2.f32 %v1748_v43 }
 0x4aa   : > { %v1852_v28 = vpop.xlane.xlu0 %1851 }
 0x4ab   : > { %v1853_v49 = vsub.f32 %v1849_v55, %v1852_v28 }
 0x4ad   : > { %v1854_v50 = vmul.f32 1.442695, %v1853_v49 }
 0x4af   : > { %3393 = vpow2.f32 %v1854_v50 }
 0x4b4   : > { %v3996_v35 = vpop.eup %3391  ;;  %1284 = vrot.lane.b32.xlu0 %v3750_v51, %s3453_s17  ;;  %s4210_s17 = sld [smem:[#allocation10_spill]] (!%p2988_p5) }
 0x4b5   : > { %v1750_v52 = vsel %vm1482_vm6, %v3996_v35, 0.0 }
 0x4b6   : > { %1751 = vadd.xlane.f32.xlu1 %v1750_v52 }
 0x4ba   : > { %v2091_v53 = vpop.xlane.xlu0 %2090 }
 0x4bb   : > { %v2092_v54 = vsub.f32 %v2088_v6, %v2091_v53 }
 0x4bc   : > { %v4002_v56 = vpop.eup %3393 }
 0x4bd   : > { %v1856_v48 = vsel %vm1482_vm6, %v4002_v56, 0.0  ;;  %v2093_v57 = vmul.f32 1.442695, %v2092_v54 }
 0x4be   : > { %v979_v55 = vpop.permute.xlu0 %978  ;;  %1857 = vadd.xlane.f32.xlu1 %v1856_v48 }
 0x4bf   : > { %v1016_v58 = vadd.f32 %v3891_v8, %v979_v55  ;;  %v1019_v59 = vadd.f32 %v3899_v17, %v979_v55  ;;  %3395 = vpow2.f32 %v2093_v57  ;;  %v1979_v17 = vpop.xlane.xlu1 %1978 }
 0x4c0   : > { %v1980_v3 = vsub.f32 %v3978_v63, %v1979_v17 }
 0x4c1   : > { %v4008_v44 = vpack.c.bf16 %v1019_v59, %v1016_v58 }
 0x4c2   : > { %v1981_v45 = vmul.f32 1.442695, %v1980_v3 }
 0x4c3   : > { %v1548_v61 = vsel %vm1546_vm8, %v4008_v44, 0  ;;  %v2203_v46 = vpop.xlane.xlu1 %2202 }
 0x4c4   : > { %3190 = vmatpush3.bf16.msra.mxu1 %v1548_v61  ;;  %v2204_v60 = vsub.f32 %v3983_v15, %v2203_v46  ;;  %3397 = vpow2.f32 %v1981_v45 }
 0x4c5   : > { %3201 = vmatprep.subr.bf16.mxu1 %v3450_v62 }
 0x4c6   : > { %v2205_v4 = vmul.f32 1.442695, %v2204_v60 }
 0x4c8   : > { %3399 = vpow2.f32 %v2205_v4 }
 0x4cc   : > { %v4013_v2 = vpop.eup %3395 }
 0x4cd   : > { %v2095_v8 = vsel %vm1482_vm6, %v4013_v2, 0.0 }
 0x4cf   : > { %1131 = vrot.lane.b32.xlu1 %v3750_v51, %s3443_s30  ;;  %s3455_s30 = smov 8  }
 0x4d1   : > { %v4023_v6 = vpop.eup %3397 }
 0x4d2   : > { %v1983_v47 = vsel %vm1482_vm6, %v4023_v6, 0.0 }
 0x4d3   : > { %2096 = vadd.xlane.f32.xlu0 %v2095_v8 }
 0x4d5   : > { %v4027_v7 = vpop.eup %3399 }
 0x4d6   : > { %v2207_v63 = vsel %vm1482_vm6, %v4027_v7, 0.0 }
 0x4e9   : > { %1437 = vrot.lane.b32.xlu0 %v3750_v51, %s3448_s25 }
 0x4ef   : > { %v2315_v11 = vpop.xlane.xlu0 %2314 }
 0x4f0   : > { %v2316_v12 = vsub.f32 %v2312_v27, %v2315_v11 }
 0x4f2   : > { %v2317_v13 = vmul.f32 1.442695, %v2316_v12 }
 0x4f3   : > { %1984 = vadd.xlane.f32.xlu1 %v1983_v47 }
 0x4f4   : > { %3401 = vpow2.f32 %v2317_v13 }
 0x4f7   : > { %2208 = vadd.xlane.f32.xlu1 %v2207_v63 }
 0x501   : > { %v4031_v14 = vpop.eup %3401 }
 0x502   : > { %v2319_v51 = vsel %vm1482_vm6, %v4031_v14, 0.0 }
 0x503   : > { %2320 = vadd.xlane.f32.xlu1 %v2319_v51 }
 0x51f   : > { %v1539_v15 = vpop.xlane.xlu1 %1538 }
 0x520   : > { %3403 = vrcp.f32 %v1539_v15 }
 0x527   : > { %v1646_v21 = vpop.xlane.xlu0 %1645 }
 0x528   : > { %3405 = vrcp.f32 %v1646_v21 }
 0x52b   : > { %v1285_v24 = vpop.permute.xlu0 %1284 }
 0x52c   : > { %v1322_v29 = vadd.f32 %v3893_v10, %v1285_v24  ;;  %v1325_v30 = vadd.f32 %v3901_v18, %v1285_v24 }
 0x52d   : > { %v3404_v16 = vpop.eup %3403 }
 0x52e   : > { %v1541_v19 = vmul.f32 %v3404_v16, %v3388_v5  ;;  %v1328_v37 = vpack.c.bf16 %v1325_v30, %v1322_v29 }
 0x530   : > { %v1542_v20 = vpack.c.bf16 %v1541_v19, %v1541_v19  ;;  %v1760_v10 = vsel %vm1546_vm8, %v1328_v37, 0  ;;  %v2214_v61 = vrot.slane %v1328_v37, 4 }
 0x532   : > { %3192 = vmatmul.mubr.msk.bf16.vlgmr.msra.gmra.mxu1 %vm1482_vm6, %v1542_v20  ;;  %v2219_v3 = vsel %vm1546_vm8, %v2214_v61, 0 }
 0x533   : > { %3203 = vmatprep.mubr.msk.bf16.mxu1 %vm3452_vm5, %v3450_v62 }
 0x535   : > { %v3406_v26 = vpop.eup %3405 }
 0x536   : > { %v1648_v34 = vmul.f32 %v3406_v26, %v3992_v40 }
 0x538   : > { %v1649_v39 = vpack.c.bf16 %v1648_v34, %v1648_v34 }
 0x53f   : > { %v1752_v22 = vpop.xlane.xlu1 %1751 }
 0x540   : > { %3407 = vrcp.f32 %v1752_v22 }
 0x547   : > { %v1858_v23 = vpop.xlane.xlu1 %1857 }
 0x548   : > { %3409 = vrcp.f32 %v1858_v23 }
 0x54b   : > { %v1132_v27 = vpop.permute.xlu1 %1131 }
 0x54c   : > { %v1169_v31 = vadd.f32 %v3917_v36, %v1132_v27  ;;  %v1172_v32 = vadd.f32 %v3922_v38, %v1132_v27 }
 0x54d   : > { %v3408_v25 = vpop.eup %3407 }
 0x54e   : > { %v1175_v33 = vpack.c.bf16 %v1172_v32, %v1169_v31  ;;  %v1754_v18 = vmul.f32 %v3408_v25, %v3996_v35  ;;  %v1990_v35 = vrot.slane %v4008_v44, 4  ;;  %v3372_v25 = vld [vmem:[%s3586_s26] sm:$0xff]  }
 0x550   : > { %v1654_v5 = vsel %vm1546_vm8, %v1175_v33, 0  ;;  %v1755_v36 = vpack.c.bf16 %v1754_v18, %v1754_v18  ;;  %v1995_v53 = vsel %vm1546_vm8, %v1990_v35, 0  ;;  %v2102_v48 = vrot.slane %v1175_v33, 4  ;;  %v3371_v33 = vld [vmem:[%s3586_s26 + $0x8] sm:$0xff]  }
 0x551   : > { %3202 = vmatpush3.bf16.msra.mxu1 %v1654_v5  ;;  %3280 = vmatpush3.bf16.msra.mxu0 %v3371_v33 }
 0x552   : > { %3213 = vmatprep.subr.bf16.mxu1 %v3450_v62  ;;  %v2107_v59 = vsel %vm1546_vm8, %v2102_v48, 0  ;;  %3281 = vmatprep.subr.bf16.mxu0 %v3450_v62 }
 0x554   : > { %3204 = vmatmul.mubr.msk.bf16.vlgmr.msra.gmra.mxu1 %vm1482_vm6, %v1649_v39 }
 0x555   : > { %3214 = vmatpush3.bf16.msra.mxu1 %v1760_v10  ;;  %3215 = vmatprep.mubr.msk.bf16.mxu1 %vm3452_vm5, %v3450_v62  ;;  %v3410_v40 = vpop.eup %3409 }
 0x556   : > { %3225 = vmatprep.subr.bf16.mxu1 %v3450_v62  ;;  %v1860_v49 = vmul.f32 %v3410_v40, %v4002_v56  ;;  %3282 = vmatpush3.bf16.msra.mxu0 %v3372_v25  ;;  %v3429_v25 = vld [vmem:[%s3572_s18] sm:$0xf] }
 0x557   : > { %3295 = vmatprep.subr.bf16.mxu0 %v3450_v62 }
 0x558   : > { %v1861_v52 = vpack.c.bf16 %v1860_v49, %v1860_v49 }
 0x55c   : > { %v2097_v38 = vpop.xlane.xlu0 %2096  ;;  %3216 = vmatmul.mubr.msk.bf16.vlgmr.msra.gmra.mxu1 %vm1482_vm6, %v1755_v36 }
 0x55d   : > { %3227 = vmatprep.mubr.msk.bf16.mxu1 %vm3452_vm5, %v3450_v62 }
 0x560   : > { %v1438_v41 = vpop.permute.xlu0 %1437 }
 0x561   : > { %v1475_v42 = vadd.f32 %v3933_v0, %v1438_v41  ;;  %v1478_v43 = vadd.f32 %v3941_v1, %v1438_v41 }
 0x563   : > { %v1481_v28 = vpack.c.bf16 %v1478_v43, %v1475_v42 }
 0x565   : > { %v1866_v50 = vsel %vm1546_vm8, %v1481_v28, 0  ;;  %v2326_v45 = vrot.slane %v1481_v28, 4 }
 0x566   : > { %3226 = vmatpush3.bf16.msra.mxu1 %v1866_v50 }
 0x567   : > { %3237 = vmatprep.subr.bf16.mxu1 %v3450_v62 }
 0x569   : > { %3228 = vmatmul.mubr.msk.bf16.vlgmr.msra.gmra.mxu1 %vm1482_vm6, %v1861_v52 }
 0x56a   : > { %3238 = vmatpush3.bf16.msra.mxu1 %v1995_v53  ;;  %3239 = vmatprep.mubr.msk.bf16.mxu1 %vm3452_vm5, %v3450_v62 }
 0x56b   : > { %3249 = vmatprep.subr.bf16.mxu1 %v3450_v62 }
 0x57c   : > { %v1985_v0 = vpop.xlane.xlu1 %1984 }
 0x57d   : > { %3411 = vrcp.f32 %v1985_v0 }
 0x57e   : > { %3413 = vrcp.f32 %v2097_v38 }
 0x580   : > { %v2209_v1 = vpop.xlane.xlu1 %2208 }
 0x581   : > { %3415 = vrcp.f32 %v2209_v1 }
 0x58a   : > { %v3412_v54 = vpop.eup %3411 }
 0x58b   : > { %v1987_v56 = vmul.f32 %v3412_v54, %v4023_v6  ;;  %v3414_v55 = vpop.eup %3413 }
 0x58c   : > { %v2321_v58 = vpop.xlane.xlu1 %2320  ;;  %v2099_v44 = vmul.f32 %v3414_v55, %v4013_v2  ;;  %v2331_v2 = vsel %vm1546_vm8, %v2326_v45, 0 }
 0x58d   : > { %v1988_v57 = vpack.c.bf16 %v1987_v56, %v1987_v56  ;;  %3417 = vrcp.f32 %v2321_v58 }
 0x58e   : > { %v2100_v8 = vpack.c.bf16 %v2099_v44, %v2099_v44  ;;  %v3416_v17 = vpop.eup %3415 }
 0x58f   : > { %3240 = vmatmul.mubr.msk.bf16.vlgmr.msra.gmra.mxu1 %vm1482_vm6, %v1988_v57  ;;  %v2211_v46 = vmul.f32 %v3416_v17, %v4027_v7  ;;  %v2971_v17 = vld [vmem:[%s652_s0] ss:$0 sm:$0xff] }
 0x590   : > { %3250 = vmatpush3.bf16.msra.mxu1 %v2107_v59  ;;  %3251 = vmatprep.mubr.msk.bf16.mxu1 %vm3452_vm5, %v3450_v62 }
 0x591   : > { %3261 = vmatprep.subr.bf16.mxu1 %v3450_v62  ;;  %v2212_v60 = vpack.c.bf16 %v2211_v46, %v2211_v46 }
 0x597   : > { %3252 = vmatmul.mubr.msk.bf16.vlgmr.msra.gmra.mxu1 %vm1482_vm6, %v2100_v8 }
 0x598   : > { %3262 = vmatpush3.bf16.msra.mxu1 %v2219_v3  ;;  %3263 = vmatprep.mubr.msk.bf16.mxu1 %vm3452_vm5, %v3450_v62 }
 0x599   : > { %3273 = vmatprep.subr.bf16.mxu1 %v3450_v62 }
 0x59a   : > { %v3418_v4 = vpop.eup %3417 }
 0x59b   : > { %v2323_v6 = vmul.f32 %v3418_v4, %v4031_v14 }
 0x59d   : > { %v2324_v11 = vpack.c.bf16 %v2323_v6, %v2323_v6 }
 0x59f   : > { %3264 = vmatmul.mubr.msk.bf16.vlgmr.msra.gmra.mxu1 %vm1482_vm6, %v2212_v60  ;;  %v3427_v60 = vld [vmem:[#allocation2] sm:$0xff] }
 0x5a0   : > { %3274 = vmatpush3.bf16.msra.mxu1 %v2331_v2  ;;  %3275 = vmatprep.mubr.msk.bf16.mxu1 %vm3452_vm5, %v3450_v62 }
 0x5a1   : > { %3287 = vmatprep.subr.bf16.mxu1 %v3450_v62 }
 0x5a7   : > { %3276 = vmatmul.mubr.msk.bf16.vlgmr.msra.gmra.mxu1 %vm1482_vm6, %v2324_v11 }
 0x5a8   : > { %3291 = vmatprep.mubr.msk.bf16.mxu1 %vm3452_vm5, %v3450_v62 }
 0x5f2   : > { %v1584_v12 = vpop.f32.mrf.mxu1 }
 0x5f4   : > { %v3193_v13 = vpop.f32.mrf.mxu1 }
 0x5f5   : > { %v3428_v13 = vld [vmem:[#allocation2 + $0x8] sm:$0xff] }
 0x5f6   : > { %v1587_v47 = vpop.f32.mrf.mxu1 }
 0x5f8   : > { %v3194_v7 = vpop.f32.mrf.mxu1 }
 0x614   : > { %v1690_v63 = vpop.f32.mrf.mxu1 }
 0x616   : > { %v3205_v51 = vpop.f32.mrf.mxu1 }
 0x618   : > { %v1693_v15 = vpop.f32.mrf.mxu1 }
 0x61a   : > { %v3206_v16 = vpop.f32.mrf.mxu1 }
 0x61c   : > { %v1796_v19 = vpop.f32.mrf.mxu1 }
 0x61e   : > { %v3217_v20 = vpop.f32.mrf.mxu1 }
 0x620   : > { %v1799_v14 = vpop.f32.mrf.mxu1 }
 0x622   : > { %v3218_v21 = vpop.f32.mrf.mxu1 }
 0x629   : > { %v1902_v22 = vpop.f32.mrf.mxu1 }
 0x62b   : > { %v3229_v23 = vpop.f32.mrf.mxu1 }
 0x62d   : > { %v1905_v24 = vpop.f32.mrf.mxu1 }
 0x62e   : > { %v3373_v24 = vld [vmem:[%s3595_s5 + $0x8] sm:$0xff]  }
 0x62f   : > { %v3230_v26 = vpop.f32.mrf.mxu1  ;;  %3288 = vmatpush3.bf16.msra.mxu1 %v3373_v24 }
 0x630   : > { %v3374_v26 = vld [vmem:[%s3595_s5] sm:$0xff]   ;;  %3289 = vmatprep.subr.bf16.mxu1 %v3450_v62 }
 0x633   : > { %3290 = vmatpush3.bf16.msra.mxu1 %v3374_v26 }
 0x64f   : > { %v2031_v27 = vpop.f32.mrf.mxu1 }
 0x651   : > { %v3241_v29 = vpop.f32.mrf.mxu1 }
 0x653   : > { %v2034_v30 = vpop.f32.mrf.mxu1 }
 0x655   : > { %v3242_v31 = vpop.f32.mrf.mxu1 }
 0x657   : > { %v2143_v32 = vpop.f32.mrf.mxu1 }
 0x658   : > { %v3354_v34 = vpack.i.bf16 %v2143_v32, %v1690_v63 }
 0x659   : > { %v3253_v37 = vpop.f32.mrf.mxu1 }
 0x65a   : > { %3355 = vrot.lane.b32.xlu1 %v3354_v34, %s3455_s30  ;;  %v2486_v37 = vsub.s32 2, %v3796_v9 }
 0x65b   : > { %v2146_v5 = vpop.f32.mrf.mxu1 }
 0x65d   : > { %v3254_v39 = vpop.f32.mrf.mxu1 }
 0x65f   : > { %v2255_v10 = vpop.f32.mrf.mxu1 }
 0x660   : > { %v3359_v18 = vpack.i.bf16 %v2255_v10, %v1796_v19  ;;  %v2487_v10 = vrot.slane %v3429_v25, %v2486_v37 }
 0x661   : > { %v3265_v36 = vpop.f32.mrf.mxu1 }
 0x662   : > { %3360 = vrot.lane.b32.xlu0 %v3359_v18, %s3456_s23  ;;  %v2492_v18 = vsub.s32 3, %v3796_v9  ;;  %v3377_v9 = vld [vmem:[%s3605_s24 + $0x28] sm:$0xff]  }
 0x663   : > { %v2258_v38 = vpop.f32.mrf.mxu1 }
 0x665   : > { %v3266_v40 = vpop.f32.mrf.mxu1 }
 0x667   : > { %v2367_v41 = vpop.f32.mrf.mxu1 }
 0x668   : > { %v3364_v42 = vpack.i.bf16 %v2367_v41, %v1902_v22  ;;  %v2493_v41 = vrot.slane %v3429_v25, %v2492_v18 }
 0x669   : > { %v3277_v43 = vpop.f32.mrf.mxu1 }
 0x66a   : > { %3365 = vrot.lane.b32.xlu1 %v3364_v42, %s3457_s8 }
 0x66b   : > { %v2370_v28 = vpop.f32.mrf.mxu1 }
 0x66d   : > { %v3278_v49 = vpop.f32.mrf.mxu1 }
 0x6cc   : > { %v3356_v50 = vpop.permute.xlu1 %3355 }
 0x6cd   : > { %v3358_v52 = vunpack.i.h.bf16 %v3356_v50  ;;  %v3357_v53 = vunpack.i.l.bf16 %v3356_v50  ;;  %v3376_v50 = vld [vmem:[%s3605_s24 + $0x30] sm:$0xff]  }
 0x6cf   : > { %v2385_v56 = vsel %vm1482_vm6, %v2031_v27, %v3358_v52  ;;  %v1920_v48 = vsel %vm1482_vm6, %v1584_v12, %v3357_v53  ;;  %v3375_v27 = vld [vmem:[%s3605_s24 + $0x38] sm:$0xff]   ;;  %v3380_v53 = vld [vmem:[%s3605_s24 + $0x10] sm:$0xff]  }
 0x6d0   : > { %v3379_v52 = vld [vmem:[%s3605_s24 + $0x18] sm:$0xff]  }
 0x6d4   : > { %v3361_v35 = vpop.permute.xlu0 %3360 }
 0x6d5   : > { %v3363_v0 = vunpack.i.h.bf16 %v3361_v35  ;;  %v3362_v1 = vunpack.i.l.bf16 %v3361_v35  ;;  %v3378_v35 = vld [vmem:[%s3605_s24 + $0x20] sm:$0xff]  }
 0x6d7   : > { %v1922_v58 = vsel %vm1921_vm9, %v1920_v48, %v3362_v1  ;;  %v2386_v59 = vsel %vm1921_vm9, %v2385_v56, %v3363_v0  ;;  %v3381_v0 = vld [vmem:[%s3605_s24 + $0x8] sm:$0xff]   ;;  %v3382_v1 = vld [vmem:[%s3605_s24] sm:$0xff]  }
 0x6dc   : > { %v3366_v54 = vpop.permute.xlu1 %3365 }
 0x6dd   : > { %v3368_v57 = vunpack.i.h.bf16 %v3366_v54  ;;  %v3367_v55 = vunpack.i.l.bf16 %v3366_v54  ;;  %v2975_v54 = vld [vmem:[%s660_s6] ss:$0 sm:$0xff] }
 0x6df   : > { %v1924_v44 = vsel %vm1923_vm10, %v1922_v58, %v3367_v55  ;;  %v2387_v61 = vsel %vm1923_vm10, %v2386_v59, %v3368_v57 }
 0x6e0   : > { %v2388_v8 = vpack.c.bf16 %v2387_v61, %v1924_v44 }
 0x6e2   : > { %3284 = vmatmul.mubr.msk.bf16.vlgmr.msra.gmra.mxu0 %vm812_vm4, %v2388_v8 }
 0x6e3   : > { %3311 = vmatprep.mubr.msk.bf16.mxu0 %vm3452_vm5, %v3450_v62  ;;  %3296 = vmatpush3.bf16.msra.mxu0 %v3375_v27 }
 0x6e4   : > { %3297 = vmatprep.subr.bf16.mxu0 %v3450_v62 }
 0x6e7   : > { %3298 = vmatpush3.bf16.msra.mxu0 %v3376_v50 }
 0x6e8   : > { %3299 = vmatprep.subr.bf16.mxu0 %v3450_v62 }
 0x6eb   : > { %3300 = vmatpush3.bf16.msra.mxu0 %v3377_v9 }
 0x6ec   : > { %3301 = vmatprep.subr.bf16.mxu0 %v3450_v62 }
 0x6ef   : > { %3302 = vmatpush3.bf16.msra.mxu0 %v3378_v35 }
 0x6f0   : > { %3303 = vmatprep.subr.bf16.mxu0 %v3450_v62 }
 0x6f3   : > { %3304 = vmatpush3.bf16.msra.mxu0 %v3379_v52 }
 0x6f4   : > { %3305 = vmatprep.subr.bf16.mxu0 %v3450_v62 }
 0x6f7   : > { %3306 = vmatpush3.bf16.msra.mxu0 %v3380_v53 }
 0x6f8   : > { %3307 = vmatprep.subr.bf16.mxu0 %v3450_v62 }
 0x6fb   : > { %3308 = vmatpush3.bf16.msra.mxu0 %v3381_v0 }
 0x6fc   : > { %3309 = vmatprep.subr.bf16.mxu0 %v3450_v62 }
 0x6ff   : > { %3310 = vmatpush3.bf16.msra.mxu0 %v3382_v1 }
 0x7a2   : > { %v2449_v3 = vpop.f32.mrf.mxu0 }
 0x7a3   : > { %v2450_v46 = vadd.f32 %v2971_v17, %v2449_v3 }
 0x7a4   : > { %v3285_v45 = vpop.f32.mrf.mxu0 }
 0x7a5   : > { %v4101_v4 = vadd.f32 %v3427_v60, %v2450_v46 }
 0x7a6   : > { %v2452_v2 = vpop.f32.mrf.mxu0 }
 0x7a7   : > { %v2453_v6 = vadd.f32 %v2971_v17, %v2452_v2  ;;  %v2458_v11 = vsel %vm812_vm4, %v4101_v4, 0.0 }
 0x7a8   : > { %2459 = vadd.xlane.f32.xlu0 %v2458_v11  ;;  %v3286_v12 = vpop.f32.mrf.mxu0  ;;  %v2979_v11 = vld [vmem:[%s668_s14] ss:$0 sm:$0xff] }
 0x7a9   : > { %v4105_v47 = vadd.f32 %v3428_v13, %v2453_v6 }
 0x7ab   : > { %v2461_v7 = vsel %vm812_vm4, %v4105_v47, 0.0 }
 0x7ac   : > { %2462 = vadd.xlane.f32.xlu1 %v2461_v7 }
 0x831   : > { %v2460_v63 = vpop.xlane.xlu0 %2459 }
 0x832   : > { %v2464_v51 = vmul.f32 0.03125, %v2460_v63 }
 0x834   : > { %v2466_v15 = vsub.f32 %v4101_v4, %v2464_v51 }
 0x835   : > { %v2463_v16 = vpop.xlane.xlu1 %2462 }
 0x836   : > { %v2465_v19 = vmul.f32 0.03125, %v2463_v16  ;;  %v2468_v20 = vmul.f32 %v2466_v15, %v2466_v15 }
 0x838   : > { %v2467_v14 = vsub.f32 %v4105_v47, %v2465_v19  ;;  %v2470_v21 = vsel %vm812_vm4, %v2468_v20, 0.0 }
 0x839   : > { %2471 = vadd.xlane.f32.xlu0 %v2470_v21 }
 0x83a   : > { %v2469_v22 = vmul.f32 %v2467_v14, %v2467_v14 }
 0x83c   : > { %v2473_v23 = vsel %vm812_vm4, %v2469_v22, 0.0 }
 0x83d   : > { %2474 = vadd.xlane.f32.xlu0 %v2473_v23 }
 0x8c2   : > { %v2472_v29 = vpop.xlane.xlu0 %2471 }
 0x8c3   : > { %v2476_v30 = vmul.f32 0.03125, %v2472_v29 }
 0x8c5   : > { %v2478_v31 = vadd.f32 1e-06, %v2476_v30 }
 0x8c6   : > { %v2475_v32 = vpop.xlane.xlu0 %2474 }
 0x8c7   : > { %3419 = vrsqrt.f32 %v2478_v31  ;;  %v2477_v33 = vmul.f32 0.03125, %v2475_v32 }
 0x8c9   : > { %v2479_v34 = vadd.f32 1e-06, %v2477_v33 }
 0x8cb   : > { %3421 = vrsqrt.f32 %v2479_v34 }
 0x8d4   : > { %v3420_v5 = vpop.eup %3419 }
 0x8d5   : > { %v2482_v39 = vmul.f32 %v3420_v5, %v2466_v15 }
 0x8d7   : > { %v2488_v40 = vmul.f32 %v2487_v10, %v2482_v39 }
 0x8d8   : > { %v3422_v36 = vpop.eup %3421 }
 0x8d9   : > { %v2483_v38 = vmul.f32 %v3422_v36, %v2467_v14  ;;  %v2494_v43 = vadd.f32 %v2493_v41, %v2488_v40 }
 0x8db   : > { %v2489_v42 = vmul.f32 %v2487_v10, %v2483_v38 }
 0x8dd   : > { %v2495_v28 = vadd.f32 %v2493_v41, %v2489_v42 }
 0x8df   : > { %v2496_v49 = vpack.c.bf16 %v2495_v28, %v2494_v43 }
 0x8e1   : > { %3292 = vmatmul.mubr.msk.bf16.vlgmr.msra.gmra.mxu1 %vm812_vm4, %v2496_v49 }
 0x9a1   : > { %v2557_v56 = vpop.f32.mrf.mxu1 }
 0x9a2   : > { %v2558_v48 = vadd.f32 %v2975_v54, %v2557_v56 }
 0x9a3   : > { %v3293_v57 = vpop.f32.mrf.mxu1 }
 0x9a4   : > { %v2566_v55 = vmul.f32 0.70710677, %v2558_v48  ;;  %v2564_v3 = vmul.f32 0.5, %v2558_v48 }
 0x9a5   : > { %v2560_v58 = vpop.f32.mrf.mxu1 }
 0x9a6   : > { %3423 = verf.f32 %v2566_v55  ;;  %v2561_v59 = vadd.f32 %v2975_v54, %v2560_v58 }
 0x9a7   : > { %v3294_v44 = vpop.f32.mrf.mxu1 }
 0x9a8   : > { %v2567_v61 = vmul.f32 0.70710677, %v2561_v59  ;;  %v2565_v46 = vmul.f32 0.5, %v2561_v59 }
 0x9aa   : > { %3425 = verf.f32 %v2567_v61 }
 0x9b3   : > { %v3424_v8 = vpop.eup %3423 }
 0x9b4   : > { %v2570_v62 = vadd.f32 1.0, %v3424_v8 }
 0x9b6   : > { %v2572_v60 = vmul.f32 %v2570_v62, %v2564_v3 }
 0x9b7   : > { %v3426_v17 = vpop.eup %3425 }
 0x9b8   : > { %v2571_v45 = vadd.f32 1.0, %v3426_v17 }
 0x9ba   : > { %v2573_v2 = vmul.f32 %v2571_v45, %v2565_v46 }
 0x9bc   : > { %v2574_v6 = vpack.c.bf16 %v2573_v2, %v2572_v60 }
 0x9be   : > { %3312 = vmatmul.mubr.bf16.vlgmr.msra.gmra.mxu0 %v2574_v6 }
 0xa7e   : > { %v2680_v12 = vpop.f32.mrf.mxu0 }
 0xa7f   : > { %v2681_v13 = vadd.f32 %v2979_v11, %v2680_v12 }
 0xa80   : > { %v3313_v7 = vpop.f32.mrf.mxu0 }
 0xa81   : > { %v2687_v63 = vadd.f32 %v2681_v13, %v4101_v4 }
 0xa82   : > { %v2683_v51 = vpop.f32.mrf.mxu0 }
 0xa83   : > { %2689 = vst.msk [vmem:[#allocation2] sm:$0xff] %vm812_vm4, %v2687_v63  ;;  %v2684_v15 = vadd.f32 %v2979_v11, %v2683_v51  ;;  %2694 = sbr.rel (%p2988_p5) target bundleno = 3203 (0xc83), region = 96 }
 0xa84   : > { %v3314_v16 = vpop.f32.mrf.mxu0 }
 0xa85   : > { %v2688_v19 = vadd.f32 %v2684_v15, %v4105_v47 }
 0xa87   : > { %2690 = vst.msk [vmem:[#allocation2 + $0x8] sm:$0xff] %vm812_vm4, %v2688_v19 }
 0xa88   : > { %v2696_v20 = vrot.slane %v2688_v19, 7  ;;  %vm2698_vm11 = vcmask 1040384   ;;  %vm2702_vm12 = vcmask 254976   ;;  %v2729_v47 = vld [vmem:[%s4190_s15 + $0x18] sm:$0xff]  ;;  %v3458_v27 = vmov 0.0   ;;  %v2728_v29 = vld [vmem:[%s4190_s15 + $0x10] sm:$0xff] }
 0xa89   : > { %3315 = vmatprep.subr.mxu0 %v3458_v27  ;;  %vm3459_vm13 = vmmov 0   ;;  %v2727_v30 = vld [vmem:[%s4190_s15 + $0x8] sm:$0xff]  ;;  %v2726_v31 = vld [vmem:[%s4190_s15] sm:$0xff]  ;;  %v2991_v36 = vld [vmem:[#allocation3] ss:$0 sm:$0xff]  ;;  %vm2810_vm14 = vcmask 1024  }
 0xa8a   : > { %v2699_v14 = vsel %vm2698_vm11, %v2687_v63, %v2696_v20  ;;  %3323 = vmatprep.mubr.msk.f32.mxu0 %vm3459_vm13, %v3458_v27  ;;  %3316 = vmatpush3.msra.mxu0 %v2729_v47  ;;  %v2989_v5 = vld [vmem:[%s4210_s17] ss:$0 sm:$0xff]  ;;  %v2990_v25 = vld [vmem:[%s4210_s17 + $0x1] ss:$0 sm:$0xff] }
 0xa8b   : > { %v2703_v21 = vsel %vm2702_vm12, %v2699_v14, 0.0  ;;  %3317 = vmatprep.subr.mxu0 %v3458_v27 }
 0xa8c   : > { %2704 = vadd.xlane.f32.xlu0 %v2703_v21  ;;  %3318 = vmatpush3.msra.mxu0 %v2728_v29 }
 0xa8d   : > { %3319 = vmatprep.subr.mxu0 %v3458_v27 }
 0xa8e   : > { %3320 = vmatpush3.msra.mxu0 %v2727_v30 }
 0xa8f   : > { %3321 = vmatprep.subr.mxu0 %v3458_v27 }
 0xa90   : > { %3322 = vmatpush3.msra.mxu0 %v2726_v31 }
 0xb15   : > { %v2705_v22 = vpop.xlane.xlu0 %2704 }
 0xb16   : > { %v2706_v4 = vmul.f32 0.03125, %v2705_v22 }
 0xb18   : > { %v2707_v23 = vsub.f32 %v2699_v14, %v2706_v4 }
 0xb1a   : > { %v2708_v24 = vmul.f32 %v2707_v23, %v2707_v23 }
 0xb1c   : > { %v2709_v26 = vsel %vm2702_vm12, %v2708_v24, 0.0 }
 0xb1d   : > { %2710 = vadd.xlane.f32.xlu0 %v2709_v26 }
 0xba6   : > { %v2711_v32 = vpop.xlane.xlu0 %2710 }
 0xba7   : > { %v2712_v33 = vmul.f32 0.03125, %v2711_v32 }
 0xba9   : > { %v2713_v34 = vadd.f32 1e-06, %v2712_v33 }
 0xbab   : > { %3430 = vrsqrt.f32 %v2713_v34 }
 0xbb8   : > { %v3431_v37 = vpop.eup %3430 }
 0xbb9   : > { %v2715_v39 = vmul.f32 %v3431_v37, %v2707_v23 }
 0xbbb   : > { %v2720_v10 = vmul.f32 %v2989_v5, %v2715_v39 }
 0xbbd   : > { %v2725_v18 = vadd.f32 %v2990_v25, %v2720_v10 }
 0xbbf   : > { %3324 = vmatmul.mubr.msk.f32.vlgmr.msra.gmra.mxu0 %vm812_vm4, %v2725_v18 }
 0xc7f   : > { %v2806_v38 = vpop.f32.mrf.mxu0 }
 0xc80   : > { %v2807_v40 = vadd.f32 %v2991_v36, %v2806_v38 }
 0xc81   : > { %v3325_v41 = vpop.f32.mrf.mxu0 }
 0xc82   : > { %2811 = vst.msk [vmem:[%s4211_s19] sm:$0x3] %vm2810_vm14, %v2807_v40 }
 0xc83 PF: > { %s4212_s5 = sld [smem:[#allocation4_spill]] }
 0xc89   : > { %s29_s26 = sadd.s32 1, %s4212_s5  }
 0xc8a   : > { %p26_p6 = scmp.ge.s32.totalorder %s29_s26, 4  }
 0xc8c   :  { %28 = sbr.rel (!%p26_p6) target bundleno = 8 (0x8), region = 146 }

</bundles_post_ra>
